<compile_context>
chip_gen: v7x
topology: tpu7x:2x2x1
jax: 0.10.0
libtpu: 0.0.40
codegen_flags: <defaults>
</compile_context>

<pallas_src>
import numpy as np

import jax
import jax.numpy as jnp
from jax.experimental import pallas as pl
from jax.experimental.pallas import tpu as pltpu


# ----------------------------------------------------------------------------
# Fused Pallas kernel (whole forward pass, single invocation, everything in VMEM)
# ----------------------------------------------------------------------------
def _fused_forward_kernel(x_ref,      # (4, N*16, 140) bf16  row-phase packed images (5 dy concatenated)
                          s_ref,      # (140, 144)     bf16  conv1 band matrix (dy-stacked)
                          t_ref,      # (5, 72, 128)   bf16  conv2 band matrices (per dy)
                          rsel_ref,   # (3, N*8, N*16) bf16  per-image 8-row window selectors
                          selall_ref, # (8*CH, N*8)    bf16  fc1 row selectors, chunk m = (k, h)
                          w1b_ref,    # (8, 64, 100)   bf16  fc1 weight blocks per (k, h)
                          b1_ref,     # (1, 72)   f32
                          b2_ref,     # (1, 64)   f32
                          fc1b_ref,   # (1, 100)  f32
                          fc2wa_ref,  # (100, 128) bf16
                          fc2wb_ref,  # (100, 128) bf16
                          fc2b_ref,   # (1, 128)  f32
                          fc3w_ref,   # (128, 199) bf16
                          fc3b_ref,   # (1, 199)  f32
                          out_ref):   # (B, 199)  f32
    f32 = jnp.float32
    bf16 = jnp.bfloat16
    bsz = out_ref.shape[0]             # batch size (static)
    ch = selall_ref.shape[0] // 8      # sublane-aligned chunk height of the fc1 selector

    sflat = s_ref[...]                 # (140, 144)

    # ---- conv1 (1->6, 5x5) + 2x2 max-pool + ReLU ------------------------------------
    # f1[P]: rows n*16 + r (r = 0..5 valid) hold pooled row i = 2r + P of image n;
    #        cols c*12 + jw (channel-major, pooled column jw).
    f1 = []
    for par in range(2):
        a0 = jnp.dot(x_ref[2 * par], sflat, preferred_element_type=f32)      # (N*16, 144)
        a1 = jnp.dot(x_ref[2 * par + 1], sflat, preferred_element_type=f32)  # (N*16, 144)
        z = jnp.maximum(a0, a1)                    # max-pool over output-row pairs
        z = jnp.maximum(z[:, :72], z[:, 72:])      # max-pool over output-col pairs (even/odd halves)
        z = jnp.maximum(z + b1_ref[...], 0.0)      # bias (commutes with max) + ReLU
        f1.append(z.astype(bf16))

    # ---- per-image shifted 8-row windows of f1 (MXU-based row gather) ----------------
    # f1w[c], c = 0..5: rows n*8 + u hold pooled row (2u + c) of image n.
    f1w = [jnp.dot(rsel_ref[c // 2], f1[c % 2], preferred_element_type=f32).astype(bf16)
           for c in range(6)]                      # each (N*8, 72)

    # ---- conv2 (6->16, 5x5) + 2x2 max-pool + ReLU ------------------------------------
    acc_a = []
    for a in range(2):
        acc = None
        for dy in range(5):
            prt = jnp.dot(f1w[a + dy], t_ref[dy], preferred_element_type=f32)
            acc = prt if acc is None else acc + prt
        acc_a.append(acc)                          # (N*8, 128)
    z = jnp.maximum(acc_a[0], acc_a[1])
    z = jnp.maximum(z[:, :64], z[:, 64:])
    z = jnp.maximum(z + b2_ref[...], 0.0)
    f2 = z.astype(bf16)                            # (N*8, 64): rows n*8+u (u<4 valid), cols co*4+v

    # ---- classifier: Linear(512, 100) on the imgs1 / imgs2 embeddings -------------------
    # (the leading nn.ReLU of `classifier` is a no-op: encoder outputs are already >= 0)
    # Select the (image, spatial-row) embedding rows first, then project block-by-block:
    #   h[b'] = sum_m f2[row(m, b')] @ w1b[m],  b' = stream*B + b,  m = k*4 + h.
    r = jnp.dot(selall_ref[...], f2, preferred_element_type=f32).astype(bf16)   # (8*CH, 64)
    h12 = None
    for m in range(8):
        blk = r[m * ch:(m + 1) * ch]               # (CH, 64), sublane-aligned static slice
        p = jnp.dot(blk, w1b_ref[m], preferred_element_type=f32)                # (CH, 100)
        h12 = p if h12 is None else h12 + p
    h12 = jnp.maximum(h12 + fc1b_ref[...], 0.0).astype(bf16)   # classifier2's leading ReLU
    h1 = h12[:bsz]                                 # (B, 100)  imgs1 stream
    h2 = h12[bsz:2 * bsz]                          # (B, 100)  imgs2 stream

    # ---- classifier2: Linear(200, 128) + ReLU + Linear(128, 199) ------------------------
    # cat([x1, x2], dim=1) @ W  ==  x1 @ W[:100] + x2 @ W[100:]
    y = (jnp.dot(h1, fc2wa_ref[...], preferred_element_type=f32)
         + jnp.dot(h2, fc2wb_ref[...], preferred_element_type=f32)
         + fc2b_ref[...])
    y = jnp.maximum(y, 0.0).astype(bf16)
    out_ref[...] = jnp.dot(y, fc3w_ref[...], preferred_element_type=f32) + fc3b_ref[...]


# ----------------------------------------------------------------------------
# Host-side glue: image row-phase packing + parameter preprocessing
# ----------------------------------------------------------------------------
def _pack_images(x):
    """(N, 28, 28) f32 -> (4, N*16, 140) bf16 with
       x5[c, n*16+r, dy*28+col] = x[n, 4*r + c + dy, col]  (zero past row 27)."""
    n_img = x.shape[0]
    xp = jnp.pad(x, ((0, 0), (0, 40), (0, 0)))           # (N, 68, 28)
    combos = []
    for c in range(4):                                    # c = 2*par + a
        chunks = [xp[:, c + dy: c + dy + 61: 4, :] for dy in range(5)]   # each (N, 16, 28)
        combos.append(jnp.concatenate(chunks, axis=-1).reshape(n_img * 16, 140))
    return jnp.stack(combos, axis=0).astype(jnp.bfloat16)


def prepare_constants(params, batch_size):
    """One-time preprocessing of the PyTorch-layout weights into matmul-friendly operands."""
    B = batch_size
    N = 4 * B                                     # 2 streams x (n//2 = 2) images x B
    CH = max(8, ((2 * B + 7) // 8) * 8)           # sublane-aligned fc1 selector chunk height
    w1 = np.asarray(params["conv1_w"], np.float32)   # (6, 1, 5, 5)
    b1 = np.asarray(params["conv1_b"], np.float32)   # (6,)
    w2 = np.asarray(params["conv2_w"], np.float32)   # (16, 6, 5, 5)
    b2 = np.asarray(params["conv2_b"], np.float32)   # (16,)
    fc1_w = np.asarray(params["fc1_w"], np.float32)  # (512, 100)

    # conv1 band matrix: rows = dy*28 + iw, cols = bpool*72 + c*12 + jw, output col ow = 2*jw + bpool.
    S = np.zeros((5, 28, 144), np.float32)
    for dy in range(5):
        for dx in range(5):
            for bpool in range(2):
                for jw in range(12):
                    iw = 2 * jw + bpool + dx
                    S[dy, iw, bpool * 72 + np.arange(6) * 12 + jw] = w1[:, 0, dy, dx]
    S_flat = S.reshape(140, 144)

    # conv2 band matrices: rows = ci*12 + j (f1 cols), cols = bpool*64 + co*4 + v, ow2 = 2v + bpool.
    T = np.zeros((5, 72, 128), np.float32)
    for dy in range(5):
        for dx in range(5):
            for bpool in range(2):
                for v in range(4):
                    j = 2 * v + bpool + dx
                    for ci in range(6):
                        T[dy, ci * 12 + j, bpool * 64 + np.arange(16) * 4 + v] = w2[:, ci, dy, dx]

    # shifted per-image 8-row window selectors: (rsel[s] @ f1) row (n,u) = f1 row (n, s+u).
    rsel = np.zeros((3, N * 8, N * 16), np.float32)
    for s in range(3):
        for n in range(N):
            for u in range(8):
                rsel[s, n * 8 + u, n * 16 + s + u] = 1.0

    # fc1 row selectors: chunk m = k*4 + h, row (stream*B + b) picks embedding row
    # (image n, spatial row h);  imgs1 groups n = k*B + b, imgs2 groups n = (2+k)*B + b.
    selall = np.zeros((8 * CH, N * 8), np.float32)
    for k in range(2):
        for h in range(4):
            m = k * 4 + h
            for bb in range(B):
                selall[m * CH + bb, (k * B + bb) * 8 + h] = 1.0          # stream 1
                selall[m * CH + B + bb, ((2 + k) * B + bb) * 8 + h] = 1.0  # stream 2

    # fc1 weights split into (k, h) blocks matching torch's flatten order c*32 + k*16 + h*4 + w.
    w1b = fc1_w.reshape(16, 2, 4, 4, 100).transpose(1, 2, 0, 3, 4).reshape(8, 64, 100)

    bf = jnp.bfloat16
    return {
        "S": jnp.asarray(S_flat, bf),
        "T": jnp.asarray(T, bf),
        "rsel": jnp.asarray(rsel, bf),
        "selall": jnp.asarray(selall, bf),
        "w1b": jnp.asarray(w1b, bf),
        "b1row": jnp.asarray(np.repeat(b1, 12)[None, :], jnp.float32),   # (1, 72),  col = c*12 + jw
        "b2row": jnp.asarray(np.repeat(b2, 4)[None, :], jnp.float32),    # (1, 64),  col = co*4 + v
        "fc1_b": jnp.asarray(params["fc1_b"], jnp.float32),
        "fc2_w_a": jnp.asarray(params["fc2_w"][:100], bf),
        "fc2_w_b": jnp.asarray(params["fc2_w"][100:], bf),
        "fc2_b": jnp.asarray(params["fc2_b"], jnp.float32),
        "fc3_w": jnp.asarray(params["fc3_w"], bf),
        "fc3_b": jnp.asarray(params["fc3_b"], jnp.float32),
    }


def separate_baseline_multi_forward(consts, imgs1, imgs2):
    """imgs1, imgs2: (n//2=2, B, 28, 28) float32.  Returns (B, 199) logits."""
    imgs1 = jnp.asarray(imgs1, jnp.float32)
    imgs2 = jnp.asarray(imgs2, jnp.float32)
    if imgs1.ndim == 5:                      # allow an explicit channel dim (B, 1, 28, 28)
        imgs1, imgs2 = imgs1[:, :, 0], imgs2[:, :, 0]
    assert imgs1.shape[0] == 2 and imgs1.shape[-2:] == (28, 28)
    B = imgs1.shape[1]
    x_all = jnp.concatenate([imgs1, imgs2], axis=0).reshape(4 * B, 28, 28)
    x5 = _pack_images(x_all)

    return pl.pallas_call(
        _fused_forward_kernel,
        out_shape=jax.ShapeDtypeStruct((B, 199), jnp.float32),
        compiler_params=pltpu.CompilerParams(vmem_limit_bytes=32 * 1024 * 1024),
    )(x5, consts["S"], consts["T"], consts["rsel"], consts["selall"],
      consts["w1b"], consts["b1row"], consts["b2row"], consts["fc1_b"],
      consts["fc2_w_a"], consts["fc2_w_b"], consts["fc2_b"],
      consts["fc3_w"], consts["fc3_b"])


# ----------------------------------------------------------------------------
# Parameters (PyTorch-equivalent layouts) + pure-JAX reference for validation
# ----------------------------------------------------------------------------
def init_params(key):
    ks = jax.random.split(key, 10)
    return {
        "conv1_w": 0.1 * jax.random.normal(ks[0], (6, 1, 5, 5), jnp.float32),
        "conv1_b": 0.1 * jax.random.normal(ks[1], (6,), jnp.float32),
        "conv2_w": 0.1 * jax.random.normal(ks[2], (16, 6, 5, 5), jnp.float32),
        "conv2_b": 0.1 * jax.random.normal(ks[3], (16,), jnp.float32),
        "fc1_w": 0.05 * jax.random.normal(ks[4], (512, 100), jnp.float32),
        "fc1_b": 0.05 * jax.random.normal(ks[5], (1, 100), jnp.float32),
        "fc2_w": 0.05 * jax.random.normal(ks[6], (200, 128), jnp.float32),
        "fc2_b": 0.05 * jax.random.normal(ks[7], (1, 128), jnp.float32),
        "fc3_w": 0.05 * jax.random.normal(ks[8], (128, 199), jnp.float32),
        "fc3_b": 0.05 * jax.random.normal(ks[9], (1, 199), jnp.float32),
    }


def reference_forward(params, imgs1, imgs2):
    """Straightforward XLA implementation of the PyTorch module (f32), for validation."""
    def conv(x, w, b):  # x NHWC, w torch (Cout, Cin, kh, kw)
        y = jax.lax.conv_general_dilated(
            x, jnp.transpose(w, (2, 3, 1, 0)), window_strides=(1, 1), padding="VALID",
            dimension_numbers=("NHWC", "HWIO", "NHWC"))
        return y + b

    def pool(x):
        return jax.lax.reduce_window(x, -jnp.inf, jax.lax.max,
                                     (1, 2, 2, 1), (1, 2, 2, 1), "VALID")

    def encoder(img):   # (B, 28, 28) -> (B, 16, 4, 4) NCHW
        h = conv(img[..., None], params["conv1_w"], params["conv1_b"])
        h = jnp.maximum(pool(h), 0.0)
        h = conv(h, params["conv2_w"], params["conv2_b"])
        h = jnp.maximum(pool(h), 0.0)
        return jnp.transpose(h, (0, 3, 1, 2))

    B = imgs1.shape[1]
    e1 = [encoder(imgs1[k]) for k in range(imgs1.shape[0])]
    e2 = [encoder(imgs2[k]) for k in range(imgs2.shape[0])]
    x1 = jnp.concatenate(e1, axis=2).reshape(B, -1)        # torch.cat(.., 2).view(-1, 512)
    x2 = jnp.concatenate(e2, axis=2).reshape(B, -1)
    x1 = jnp.maximum(x1, 0.0) @ params["fc1_w"] + params["fc1_b"]
    x2 = jnp.maximum(x2, 0.0) @ params["fc1_w"] + params["fc1_b"]
    x = jnp.concatenate([x1, x2], axis=1)
    x = jnp.maximum(x, 0.0) @ params["fc2_w"] + params["fc2_b"]
    x = jnp.maximum(x, 0.0) @ params["fc3_w"] + params["fc3_b"]
    return x


if __name__ == "__main__":
    key = jax.random.PRNGKey(0)
    kp, k1, k2 = jax.random.split(key, 3)
    params = init_params(kp)

    B = 2                                   # batch size; n = 4 -> n // 2 = 2 images per stream
    imgs1 = jax.random.normal(k1, (2, B, 28, 28), jnp.float32)
    imgs2 = jax.random.normal(k2, (2, B, 28, 28), jnp.float32)

    consts = prepare_constants(params, B)
    fwd = jax.jit(separate_baseline_multi_forward)
    out = jax.block_until_ready(fwd(consts, imgs1, imgs2))
    assert out.shape == (B, 199)

    ref = jax.block_until_ready(reference_forward(params, imgs1, imgs2))
    max_err = float(jnp.max(jnp.abs(out - ref)))
    assert max_err < 1e-1, f"kernel deviates from f32 reference: max abs err {max_err}"
    print("KERNEL_OK")
</pallas_src>

<mosaic_0001>
module attributes {stable_mosaic.version = 11 : i64} {
  func.func @_fused_forward_kernel(%arg0: memref<4x128x140xbf16, #tpu.memory_space<vmem>>, %arg1: memref<140x144xbf16, #tpu.memory_space<vmem>>, %arg2: memref<5x72x128xbf16, #tpu.memory_space<vmem>>, %arg3: memref<3x64x128xbf16, #tpu.memory_space<vmem>>, %arg4: memref<64x64xbf16, #tpu.memory_space<vmem>>, %arg5: memref<8x64x100xbf16, #tpu.memory_space<vmem>>, %arg6: memref<1x72xf32, #tpu.memory_space<vmem>>, %arg7: memref<1x64xf32, #tpu.memory_space<vmem>>, %arg8: memref<1x100xf32, #tpu.memory_space<vmem>>, %arg9: memref<100x128xbf16, #tpu.memory_space<vmem>>, %arg10: memref<100x128xbf16, #tpu.memory_space<vmem>>, %arg11: memref<1x128xf32, #tpu.memory_space<vmem>>, %arg12: memref<128x199xbf16, #tpu.memory_space<vmem>>, %arg13: memref<1x199xf32, #tpu.memory_space<vmem>>, %arg14: memref<2x199xf32, #tpu.memory_space<vmem>>) attributes {dimension_semantics = [], scalar_prefetch = 0 : i64, scratch_operands = 0 : i64, tpu.core_type = #tpu.core_type<tc>} {
    %c0 = arith.constant 0 : index
    %c0_0 = arith.constant 0 : index
    %0 = vector.load %arg1[%c0, %c0_0] : memref<140x144xbf16, #tpu.memory_space<vmem>>, vector<140x144xbf16>
    %c0_1 = arith.constant 0 : index
    %c0_2 = arith.constant 0 : index
    %c0_3 = arith.constant 0 : index
    %1 = vector.load %arg0[%c0_1, %c0_2, %c0_3] : memref<4x128x140xbf16, #tpu.memory_space<vmem>>, vector<1x128x140xbf16>
    %2 = vector.shape_cast %1 : vector<1x128x140xbf16> to vector<128x140xbf16>
    %cst = arith.constant dense<0.000000e+00> : vector<128x144xf32>
    %3 = tpu.matmul %2, %0, %cst {dimension_numbers = #tpu.dot_dimension_numbers<[1], [0], [0], [1], [0, 0, 1, 1], [], []>} : vector<128x140xbf16>, vector<140x144xbf16>, vector<128x144xf32> -> vector<128x144xf32>
    %c1 = arith.constant 1 : index
    %c0_4 = arith.constant 0 : index
    %c0_5 = arith.constant 0 : index
    %4 = vector.load %arg0[%c1, %c0_4, %c0_5] : memref<4x128x140xbf16, #tpu.memory_space<vmem>>, vector<1x128x140xbf16>
    %5 = vector.shape_cast %4 : vector<1x128x140xbf16> to vector<128x140xbf16>
    %cst_6 = arith.constant dense<0.000000e+00> : vector<128x144xf32>
    %6 = tpu.matmul %5, %0, %cst_6 {dimension_numbers = #tpu.dot_dimension_numbers<[1], [0], [0], [1], [0, 0, 1, 1], [], []>} : vector<128x140xbf16>, vector<140x144xbf16>, vector<128x144xf32> -> vector<128x144xf32>
    %7 = arith.maximumf %3, %6 : vector<128x144xf32>
    %8 = vector.extract_strided_slice %7 {offsets = [0, 0], sizes = [128, 72], strides = [1, 1]} : vector<128x144xf32> to vector<128x72xf32>
    %9 = vector.extract_strided_slice %7 {offsets = [0, 72], sizes = [128, 72], strides = [1, 1]} : vector<128x144xf32> to vector<128x72xf32>
    %10 = arith.maximumf %8, %9 : vector<128x72xf32>
    %c0_7 = arith.constant 0 : index
    %c0_8 = arith.constant 0 : index
    %11 = vector.load %arg6[%c0_7, %c0_8] : memref<1x72xf32, #tpu.memory_space<vmem>>, vector<1x72xf32>
    %12 = vector.broadcast %11 : vector<1x72xf32> to vector<128x72xf32>
    %13 = arith.addf %10, %12 : vector<128x72xf32>
    %cst_9 = arith.constant 0.000000e+00 : f32
    %14 = vector.broadcast %cst_9 : f32 to vector<128x72xf32>
    %15 = arith.maximumf %13, %14 : vector<128x72xf32>
    %16 = arith.truncf %15 : vector<128x72xf32> to vector<128x72xbf16>
    %c2 = arith.constant 2 : index
    %c0_10 = arith.constant 0 : index
    %c0_11 = arith.constant 0 : index
    %17 = vector.load %arg0[%c2, %c0_10, %c0_11] : memref<4x128x140xbf16, #tpu.memory_space<vmem>>, vector<1x128x140xbf16>
    %18 = vector.shape_cast %17 : vector<1x128x140xbf16> to vector<128x140xbf16>
    %cst_12 = arith.constant dense<0.000000e+00> : vector<128x144xf32>
    %19 = tpu.matmul %18, %0, %cst_12 {dimension_numbers = #tpu.dot_dimension_numbers<[1], [0], [0], [1], [0, 0, 1, 1], [], []>} : vector<128x140xbf16>, vector<140x144xbf16>, vector<128x144xf32> -> vector<128x144xf32>
    %c3 = arith.constant 3 : index
    %c0_13 = arith.constant 0 : index
    %c0_14 = arith.constant 0 : index
    %20 = vector.load %arg0[%c3, %c0_13, %c0_14] : memref<4x128x140xbf16, #tpu.memory_space<vmem>>, vector<1x128x140xbf16>
    %21 = vector.shape_cast %20 : vector<1x128x140xbf16> to vector<128x140xbf16>
    %cst_15 = arith.constant dense<0.000000e+00> : vector<128x144xf32>
    %22 = tpu.matmul %21, %0, %cst_15 {dimension_numbers = #tpu.dot_dimension_numbers<[1], [0], [0], [1], [0, 0, 1, 1], [], []>} : vector<128x140xbf16>, vector<140x144xbf16>, vector<128x144xf32> -> vector<128x144xf32>
    %23 = arith.maximumf %19, %22 : vector<128x144xf32>
    %24 = vector.extract_strided_slice %23 {offsets = [0, 0], sizes = [128, 72], strides = [1, 1]} : vector<128x144xf32> to vector<128x72xf32>
    %25 = vector.extract_strided_slice %23 {offsets = [0, 72], sizes = [128, 72], strides = [1, 1]} : vector<128x144xf32> to vector<128x72xf32>
    %26 = arith.maximumf %24, %25 : vector<128x72xf32>
    %c0_16 = arith.constant 0 : index
    %c0_17 = arith.constant 0 : index
    %27 = vector.load %arg6[%c0_16, %c0_17] : memref<1x72xf32, #tpu.memory_space<vmem>>, vector<1x72xf32>
    %28 = vector.broadcast %27 : vector<1x72xf32> to vector<128x72xf32>
    %29 = arith.addf %26, %28 : vector<128x72xf32>
    %cst_18 = arith.constant 0.000000e+00 : f32
    %30 = vector.broadcast %cst_18 : f32 to vector<128x72xf32>
    %31 = arith.maximumf %29, %30 : vector<128x72xf32>
    %32 = arith.truncf %31 : vector<128x72xf32> to vector<128x72xbf16>
    %c0_19 = arith.constant 0 : index
    %c0_20 = arith.constant 0 : index
    %c0_21 = arith.constant 0 : index
    %33 = vector.load %arg3[%c0_19, %c0_20, %c0_21] : memref<3x64x128xbf16, #tpu.memory_space<vmem>>, vector<1x64x128xbf16>
    %34 = vector.shape_cast %33 : vector<1x64x128xbf16> to vector<64x128xbf16>
    %cst_22 = arith.constant dense<0.000000e+00> : vector<64x72xf32>
    %35 = tpu.matmul %34, %16, %cst_22 {dimension_numbers = #tpu.dot_dimension_numbers<[1], [0], [0], [1], [0, 0, 1, 1], [], []>} : vector<64x128xbf16>, vector<128x72xbf16>, vector<64x72xf32> -> vector<64x72xf32>
    %36 = arith.truncf %35 : vector<64x72xf32> to vector<64x72xbf16>
    %c0_23 = arith.constant 0 : index
    %c0_24 = arith.constant 0 : index
    %c0_25 = arith.constant 0 : index
    %37 = vector.load %arg3[%c0_23, %c0_24, %c0_25] : memref<3x64x128xbf16, #tpu.memory_space<vmem>>, vector<1x64x128xbf16>
    %38 = vector.shape_cast %37 : vector<1x64x128xbf16> to vector<64x128xbf16>
    %cst_26 = arith.constant dense<0.000000e+00> : vector<64x72xf32>
    %39 = tpu.matmul %38, %32, %cst_26 {dimension_numbers = #tpu.dot_dimension_numbers<[1], [0], [0], [1], [0, 0, 1, 1], [], []>} : vector<64x128xbf16>, vector<128x72xbf16>, vector<64x72xf32> -> vector<64x72xf32>
    %40 = arith.truncf %39 : vector<64x72xf32> to vector<64x72xbf16>
    %c1_27 = arith.constant 1 : index
    %c0_28 = arith.constant 0 : index
    %c0_29 = arith.constant 0 : index
    %41 = vector.load %arg3[%c1_27, %c0_28, %c0_29] : memref<3x64x128xbf16, #tpu.memory_space<vmem>>, vector<1x64x128xbf16>
    %42 = vector.shape_cast %41 : vector<1x64x128xbf16> to vector<64x128xbf16>
    %cst_30 = arith.constant dense<0.000000e+00> : vector<64x72xf32>
    %43 = tpu.matmul %42, %16, %cst_30 {dimension_numbers = #tpu.dot_dimension_numbers<[1], [0], [0], [1], [0, 0, 1, 1], [], []>} : vector<64x128xbf16>, vector<128x72xbf16>, vector<64x72xf32> -> vector<64x72xf32>
    %44 = arith.truncf %43 : vector<64x72xf32> to vector<64x72xbf16>
    %c1_31 = arith.constant 1 : index
    %c0_32 = arith.constant 0 : index
    %c0_33 = arith.constant 0 : index
    %45 = vector.load %arg3[%c1_31, %c0_32, %c0_33] : memref<3x64x128xbf16, #tpu.memory_space<vmem>>, vector<1x64x128xbf16>
    %46 = vector.shape_cast %45 : vector<1x64x128xbf16> to vector<64x128xbf16>
    %cst_34 = arith.constant dense<0.000000e+00> : vector<64x72xf32>
    %47 = tpu.matmul %46, %32, %cst_34 {dimension_numbers = #tpu.dot_dimension_numbers<[1], [0], [0], [1], [0, 0, 1, 1], [], []>} : vector<64x128xbf16>, vector<128x72xbf16>, vector<64x72xf32> -> vector<64x72xf32>
    %48 = arith.truncf %47 : vector<64x72xf32> to vector<64x72xbf16>
    %c2_35 = arith.constant 2 : index
    %c0_36 = arith.constant 0 : index
    %c0_37 = arith.constant 0 : index
    %49 = vector.load %arg3[%c2_35, %c0_36, %c0_37] : memref<3x64x128xbf16, #tpu.memory_space<vmem>>, vector<1x64x128xbf16>
    %50 = vector.shape_cast %49 : vector<1x64x128xbf16> to vector<64x128xbf16>
    %cst_38 = arith.constant dense<0.000000e+00> : vector<64x72xf32>
    %51 = tpu.matmul %50, %16, %cst_38 {dimension_numbers = #tpu.dot_dimension_numbers<[1], [0], [0], [1], [0, 0, 1, 1], [], []>} : vector<64x128xbf16>, vector<128x72xbf16>, vector<64x72xf32> -> vector<64x72xf32>
    %52 = arith.truncf %51 : vector<64x72xf32> to vector<64x72xbf16>
    %c2_39 = arith.constant 2 : index
    %c0_40 = arith.constant 0 : index
    %c0_41 = arith.constant 0 : index
    %53 = vector.load %arg3[%c2_39, %c0_40, %c0_41] : memref<3x64x128xbf16, #tpu.memory_space<vmem>>, vector<1x64x128xbf16>
    %54 = vector.shape_cast %53 : vector<1x64x128xbf16> to vector<64x128xbf16>
    %cst_42 = arith.constant dense<0.000000e+00> : vector<64x72xf32>
    %55 = tpu.matmul %54, %32, %cst_42 {dimension_numbers = #tpu.dot_dimension_numbers<[1], [0], [0], [1], [0, 0, 1, 1], [], []>} : vector<64x128xbf16>, vector<128x72xbf16>, vector<64x72xf32> -> vector<64x72xf32>
    %56 = arith.truncf %55 : vector<64x72xf32> to vector<64x72xbf16>
    %c0_43 = arith.constant 0 : index
    %c0_44 = arith.constant 0 : index
    %c0_45 = arith.constant 0 : index
    %57 = vector.load %arg2[%c0_43, %c0_44, %c0_45] : memref<5x72x128xbf16, #tpu.memory_space<vmem>>, vector<1x72x128xbf16>
    %58 = vector.shape_cast %57 : vector<1x72x128xbf16> to vector<72x128xbf16>
    %cst_46 = arith.constant dense<0.000000e+00> : vector<64x128xf32>
    %59 = tpu.matmul %36, %58, %cst_46 {dimension_numbers = #tpu.dot_dimension_numbers<[1], [0], [0], [1], [0, 0, 1, 1], [], []>} : vector<64x72xbf16>, vector<72x128xbf16>, vector<64x128xf32> -> vector<64x128xf32>
    %c1_47 = arith.constant 1 : index
    %c0_48 = arith.constant 0 : index
    %c0_49 = arith.constant 0 : index
    %60 = vector.load %arg2[%c1_47, %c0_48, %c0_49] : memref<5x72x128xbf16, #tpu.memory_space<vmem>>, vector<1x72x128xbf16>
    %61 = vector.shape_cast %60 : vector<1x72x128xbf16> to vector<72x128xbf16>
    %cst_50 = arith.constant dense<0.000000e+00> : vector<64x128xf32>
    %62 = tpu.matmul %40, %61, %cst_50 {dimension_numbers = #tpu.dot_dimension_numbers<[1], [0], [0], [1], [0, 0, 1, 1], [], []>} : vector<64x72xbf16>, vector<72x128xbf16>, vector<64x128xf32> -> vector<64x128xf32>
    %63 = arith.addf %59, %62 : vector<64x128xf32>
    %c2_51 = arith.constant 2 : index
    %c0_52 = arith.constant 0 : index
    %c0_53 = arith.constant 0 : index
    %64 = vector.load %arg2[%c2_51, %c0_52, %c0_53] : memref<5x72x128xbf16, #tpu.memory_space<vmem>>, vector<1x72x128xbf16>
    %65 = vector.shape_cast %64 : vector<1x72x128xbf16> to vector<72x128xbf16>
    %cst_54 = arith.constant dense<0.000000e+00> : vector<64x128xf32>
    %66 = tpu.matmul %44, %65, %cst_54 {dimension_numbers = #tpu.dot_dimension_numbers<[1], [0], [0], [1], [0, 0, 1, 1], [], []>} : vector<64x72xbf16>, vector<72x128xbf16>, vector<64x128xf32> -> vector<64x128xf32>
    %67 = arith.addf %63, %66 : vector<64x128xf32>
    %c3_55 = arith.constant 3 : index
    %c0_56 = arith.constant 0 : index
    %c0_57 = arith.constant 0 : index
    %68 = vector.load %arg2[%c3_55, %c0_56, %c0_57] : memref<5x72x128xbf16, #tpu.memory_space<vmem>>, vector<1x72x128xbf16>
    %69 = vector.shape_cast %68 : vector<1x72x128xbf16> to vector<72x128xbf16>
    %cst_58 = arith.constant dense<0.000000e+00> : vector<64x128xf32>
    %70 = tpu.matmul %48, %69, %cst_58 {dimension_numbers = #tpu.dot_dimension_numbers<[1], [0], [0], [1], [0, 0, 1, 1], [], []>} : vector<64x72xbf16>, vector<72x128xbf16>, vector<64x128xf32> -> vector<64x128xf32>
    %71 = arith.addf %67, %70 : vector<64x128xf32>
    %c4 = arith.constant 4 : index
    %c0_59 = arith.constant 0 : index
    %c0_60 = arith.constant 0 : index
    %72 = vector.load %arg2[%c4, %c0_59, %c0_60] : memref<5x72x128xbf16, #tpu.memory_space<vmem>>, vector<1x72x128xbf16>
    %73 = vector.shape_cast %72 : vector<1x72x128xbf16> to vector<72x128xbf16>
    %cst_61 = arith.constant dense<0.000000e+00> : vector<64x128xf32>
    %74 = tpu.matmul %52, %73, %cst_61 {dimension_numbers = #tpu.dot_dimension_numbers<[1], [0], [0], [1], [0, 0, 1, 1], [], []>} : vector<64x72xbf16>, vector<72x128xbf16>, vector<64x128xf32> -> vector<64x128xf32>
    %75 = arith.addf %71, %74 : vector<64x128xf32>
    %c0_62 = arith.constant 0 : index
    %c0_63 = arith.constant 0 : index
    %c0_64 = arith.constant 0 : index
    %76 = vector.load %arg2[%c0_62, %c0_63, %c0_64] : memref<5x72x128xbf16, #tpu.memory_space<vmem>>, vector<1x72x128xbf16>
    %77 = vector.shape_cast %76 : vector<1x72x128xbf16> to vector<72x128xbf16>
    %cst_65 = arith.constant dense<0.000000e+00> : vector<64x128xf32>
    %78 = tpu.matmul %40, %77, %cst_65 {dimension_numbers = #tpu.dot_dimension_numbers<[1], [0], [0], [1], [0, 0, 1, 1], [], []>} : vector<64x72xbf16>, vector<72x128xbf16>, vector<64x128xf32> -> vector<64x128xf32>
    %c1_66 = arith.constant 1 : index
    %c0_67 = arith.constant 0 : index
    %c0_68 = arith.constant 0 : index
    %79 = vector.load %arg2[%c1_66, %c0_67, %c0_68] : memref<5x72x128xbf16, #tpu.memory_space<vmem>>, vector<1x72x128xbf16>
    %80 = vector.shape_cast %79 : vector<1x72x128xbf16> to vector<72x128xbf16>
    %cst_69 = arith.constant dense<0.000000e+00> : vector<64x128xf32>
    %81 = tpu.matmul %44, %80, %cst_69 {dimension_numbers = #tpu.dot_dimension_numbers<[1], [0], [0], [1], [0, 0, 1, 1], [], []>} : vector<64x72xbf16>, vector<72x128xbf16>, vector<64x128xf32> -> vector<64x128xf32>
    %82 = arith.addf %78, %81 : vector<64x128xf32>
    %c2_70 = arith.constant 2 : index
    %c0_71 = arith.constant 0 : index
    %c0_72 = arith.constant 0 : index
    %83 = vector.load %arg2[%c2_70, %c0_71, %c0_72] : memref<5x72x128xbf16, #tpu.memory_space<vmem>>, vector<1x72x128xbf16>
    %84 = vector.shape_cast %83 : vector<1x72x128xbf16> to vector<72x128xbf16>
    %cst_73 = arith.constant dense<0.000000e+00> : vector<64x128xf32>
    %85 = tpu.matmul %48, %84, %cst_73 {dimension_numbers = #tpu.dot_dimension_numbers<[1], [0], [0], [1], [0, 0, 1, 1], [], []>} : vector<64x72xbf16>, vector<72x128xbf16>, vector<64x128xf32> -> vector<64x128xf32>
    %86 = arith.addf %82, %85 : vector<64x128xf32>
    %c3_74 = arith.constant 3 : index
    %c0_75 = arith.constant 0 : index
    %c0_76 = arith.constant 0 : index
    %87 = vector.load %arg2[%c3_74, %c0_75, %c0_76] : memref<5x72x128xbf16, #tpu.memory_space<vmem>>, vector<1x72x128xbf16>
    %88 = vector.shape_cast %87 : vector<1x72x128xbf16> to vector<72x128xbf16>
    %cst_77 = arith.constant dense<0.000000e+00> : vector<64x128xf32>
    %89 = tpu.matmul %52, %88, %cst_77 {dimension_numbers = #tpu.dot_dimension_numbers<[1], [0], [0], [1], [0, 0, 1, 1], [], []>} : vector<64x72xbf16>, vector<72x128xbf16>, vector<64x128xf32> -> vector<64x128xf32>
    %90 = arith.addf %86, %89 : vector<64x128xf32>
    %c4_78 = arith.constant 4 : index
    %c0_79 = arith.constant 0 : index
    %c0_80 = arith.constant 0 : index
    %91 = vector.load %arg2[%c4_78, %c0_79, %c0_80] : memref<5x72x128xbf16, #tpu.memory_space<vmem>>, vector<1x72x128xbf16>
    %92 = vector.shape_cast %91 : vector<1x72x128xbf16> to vector<72x128xbf16>
    %cst_81 = arith.constant dense<0.000000e+00> : vector<64x128xf32>
    %93 = tpu.matmul %56, %92, %cst_81 {dimension_numbers = #tpu.dot_dimension_numbers<[1], [0], [0], [1], [0, 0, 1, 1], [], []>} : vector<64x72xbf16>, vector<72x128xbf16>, vector<64x128xf32> -> vector<64x128xf32>
    %94 = arith.addf %90, %93 : vector<64x128xf32>
    %95 = arith.maximumf %75, %94 : vector<64x128xf32>
    %96 = vector.extract_strided_slice %95 {offsets = [0, 0], sizes = [64, 64], strides = [1, 1]} : vector<64x128xf32> to vector<64x64xf32>
    %97 = vector.extract_strided_slice %95 {offsets = [0, 64], sizes = [64, 64], strides = [1, 1]} : vector<64x128xf32> to vector<64x64xf32>
    %98 = arith.maximumf %96, %97 : vector<64x64xf32>
    %c0_82 = arith.constant 0 : index
    %c0_83 = arith.constant 0 : index
    %99 = vector.load %arg7[%c0_82, %c0_83] : memref<1x64xf32, #tpu.memory_space<vmem>>, vector<1x64xf32>
    %100 = vector.broadcast %99 : vector<1x64xf32> to vector<64x64xf32>
    %101 = arith.addf %98, %100 : vector<64x64xf32>
    %cst_84 = arith.constant 0.000000e+00 : f32
    %102 = vector.broadcast %cst_84 : f32 to vector<64x64xf32>
    %103 = arith.maximumf %101, %102 : vector<64x64xf32>
    %104 = arith.truncf %103 : vector<64x64xf32> to vector<64x64xbf16>
    %c0_85 = arith.constant 0 : index
    %c0_86 = arith.constant 0 : index
    %105 = vector.load %arg4[%c0_85, %c0_86] : memref<64x64xbf16, #tpu.memory_space<vmem>>, vector<64x64xbf16>
    %cst_87 = arith.constant dense<0.000000e+00> : vector<64x64xf32>
    %106 = tpu.matmul %105, %104, %cst_87 {dimension_numbers = #tpu.dot_dimension_numbers<[1], [0], [0], [1], [0, 0, 1, 1], [], []>} : vector<64x64xbf16>, vector<64x64xbf16>, vector<64x64xf32> -> vector<64x64xf32>
    %107 = arith.truncf %106 : vector<64x64xf32> to vector<64x64xbf16>
    %108 = vector.extract_strided_slice %107 {offsets = [0, 0], sizes = [8, 64], strides = [1, 1]} : vector<64x64xbf16> to vector<8x64xbf16>
    %c0_88 = arith.constant 0 : index
    %c0_89 = arith.constant 0 : index
    %c0_90 = arith.constant 0 : index
    %109 = vector.load %arg5[%c0_88, %c0_89, %c0_90] : memref<8x64x100xbf16, #tpu.memory_space<vmem>>, vector<1x64x100xbf16>
    %110 = vector.shape_cast %109 : vector<1x64x100xbf16> to vector<64x100xbf16>
    %cst_91 = arith.constant dense<0.000000e+00> : vector<8x100xf32>
    %111 = tpu.matmul %108, %110, %cst_91 {dimension_numbers = #tpu.dot_dimension_numbers<[1], [0], [0], [1], [0, 0, 1, 1], [], []>} : vector<8x64xbf16>, vector<64x100xbf16>, vector<8x100xf32> -> vector<8x100xf32>
    %112 = vector.extract_strided_slice %107 {offsets = [8, 0], sizes = [8, 64], strides = [1, 1]} : vector<64x64xbf16> to vector<8x64xbf16>
    %c1_92 = arith.constant 1 : index
    %c0_93 = arith.constant 0 : index
    %c0_94 = arith.constant 0 : index
    %113 = vector.load %arg5[%c1_92, %c0_93, %c0_94] : memref<8x64x100xbf16, #tpu.memory_space<vmem>>, vector<1x64x100xbf16>
    %114 = vector.shape_cast %113 : vector<1x64x100xbf16> to vector<64x100xbf16>
    %cst_95 = arith.constant dense<0.000000e+00> : vector<8x100xf32>
    %115 = tpu.matmul %112, %114, %cst_95 {dimension_numbers = #tpu.dot_dimension_numbers<[1], [0], [0], [1], [0, 0, 1, 1], [], []>} : vector<8x64xbf16>, vector<64x100xbf16>, vector<8x100xf32> -> vector<8x100xf32>
    %116 = arith.addf %111, %115 : vector<8x100xf32>
    %117 = vector.extract_strided_slice %107 {offsets = [16, 0], sizes = [8, 64], strides = [1, 1]} : vector<64x64xbf16> to vector<8x64xbf16>
    %c2_96 = arith.constant 2 : index
    %c0_97 = arith.constant 0 : index
    %c0_98 = arith.constant 0 : index
    %118 = vector.load %arg5[%c2_96, %c0_97, %c0_98] : memref<8x64x100xbf16, #tpu.memory_space<vmem>>, vector<1x64x100xbf16>
    %119 = vector.shape_cast %118 : vector<1x64x100xbf16> to vector<64x100xbf16>
    %cst_99 = arith.constant dense<0.000000e+00> : vector<8x100xf32>
    %120 = tpu.matmul %117, %119, %cst_99 {dimension_numbers = #tpu.dot_dimension_numbers<[1], [0], [0], [1], [0, 0, 1, 1], [], []>} : vector<8x64xbf16>, vector<64x100xbf16>, vector<8x100xf32> -> vector<8x100xf32>
    %121 = arith.addf %116, %120 : vector<8x100xf32>
    %122 = vector.extract_strided_slice %107 {offsets = [24, 0], sizes = [8, 64], strides = [1, 1]} : vector<64x64xbf16> to vector<8x64xbf16>
    %c3_100 = arith.constant 3 : index
    %c0_101 = arith.constant 0 : index
    %c0_102 = arith.constant 0 : index
    %123 = vector.load %arg5[%c3_100, %c0_101, %c0_102] : memref<8x64x100xbf16, #tpu.memory_space<vmem>>, vector<1x64x100xbf16>
    %124 = vector.shape_cast %123 : vector<1x64x100xbf16> to vector<64x100xbf16>
    %cst_103 = arith.constant dense<0.000000e+00> : vector<8x100xf32>
    %125 = tpu.matmul %122, %124, %cst_103 {dimension_numbers = #tpu.dot_dimension_numbers<[1], [0], [0], [1], [0, 0, 1, 1], [], []>} : vector<8x64xbf16>, vector<64x100xbf16>, vector<8x100xf32> -> vector<8x100xf32>
    %126 = arith.addf %121, %125 : vector<8x100xf32>
    %127 = vector.extract_strided_slice %107 {offsets = [32, 0], sizes = [8, 64], strides = [1, 1]} : vector<64x64xbf16> to vector<8x64xbf16>
    %c4_104 = arith.constant 4 : index
    %c0_105 = arith.constant 0 : index
    %c0_106 = arith.constant 0 : index
    %128 = vector.load %arg5[%c4_104, %c0_105, %c0_106] : memref<8x64x100xbf16, #tpu.memory_space<vmem>>, vector<1x64x100xbf16>
    %129 = vector.shape_cast %128 : vector<1x64x100xbf16> to vector<64x100xbf16>
    %cst_107 = arith.constant dense<0.000000e+00> : vector<8x100xf32>
    %130 = tpu.matmul %127, %129, %cst_107 {dimension_numbers = #tpu.dot_dimension_numbers<[1], [0], [0], [1], [0, 0, 1, 1], [], []>} : vector<8x64xbf16>, vector<64x100xbf16>, vector<8x100xf32> -> vector<8x100xf32>
    %131 = arith.addf %126, %130 : vector<8x100xf32>
    %132 = vector.extract_strided_slice %107 {offsets = [40, 0], sizes = [8, 64], strides = [1, 1]} : vector<64x64xbf16> to vector<8x64xbf16>
    %c5 = arith.constant 5 : index
    %c0_108 = arith.constant 0 : index
    %c0_109 = arith.constant 0 : index
    %133 = vector.load %arg5[%c5, %c0_108, %c0_109] : memref<8x64x100xbf16, #tpu.memory_space<vmem>>, vector<1x64x100xbf16>
    %134 = vector.shape_cast %133 : vector<1x64x100xbf16> to vector<64x100xbf16>
    %cst_110 = arith.constant dense<0.000000e+00> : vector<8x100xf32>
    %135 = tpu.matmul %132, %134, %cst_110 {dimension_numbers = #tpu.dot_dimension_numbers<[1], [0], [0], [1], [0, 0, 1, 1], [], []>} : vector<8x64xbf16>, vector<64x100xbf16>, vector<8x100xf32> -> vector<8x100xf32>
    %136 = arith.addf %131, %135 : vector<8x100xf32>
    %137 = vector.extract_strided_slice %107 {offsets = [48, 0], sizes = [8, 64], strides = [1, 1]} : vector<64x64xbf16> to vector<8x64xbf16>
    %c6 = arith.constant 6 : index
    %c0_111 = arith.constant 0 : index
    %c0_112 = arith.constant 0 : index
    %138 = vector.load %arg5[%c6, %c0_111, %c0_112] : memref<8x64x100xbf16, #tpu.memory_space<vmem>>, vector<1x64x100xbf16>
    %139 = vector.shape_cast %138 : vector<1x64x100xbf16> to vector<64x100xbf16>
    %cst_113 = arith.constant dense<0.000000e+00> : vector<8x100xf32>
    %140 = tpu.matmul %137, %139, %cst_113 {dimension_numbers = #tpu.dot_dimension_numbers<[1], [0], [0], [1], [0, 0, 1, 1], [], []>} : vector<8x64xbf16>, vector<64x100xbf16>, vector<8x100xf32> -> vector<8x100xf32>
    %141 = arith.addf %136, %140 : vector<8x100xf32>
    %142 = vector.extract_strided_slice %107 {offsets = [56, 0], sizes = [8, 64], strides = [1, 1]} : vector<64x64xbf16> to vector<8x64xbf16>
    %c7 = arith.constant 7 : index
    %c0_114 = arith.constant 0 : index
    %c0_115 = arith.constant 0 : index
    %143 = vector.load %arg5[%c7, %c0_114, %c0_115] : memref<8x64x100xbf16, #tpu.memory_space<vmem>>, vector<1x64x100xbf16>
    %144 = vector.shape_cast %143 : vector<1x64x100xbf16> to vector<64x100xbf16>
    %cst_116 = arith.constant dense<0.000000e+00> : vector<8x100xf32>
    %145 = tpu.matmul %142, %144, %cst_116 {dimension_numbers = #tpu.dot_dimension_numbers<[1], [0], [0], [1], [0, 0, 1, 1], [], []>} : vector<8x64xbf16>, vector<64x100xbf16>, vector<8x100xf32> -> vector<8x100xf32>
    %146 = arith.addf %141, %145 : vector<8x100xf32>
    %c0_117 = arith.constant 0 : index
    %c0_118 = arith.constant 0 : index
    %147 = vector.load %arg8[%c0_117, %c0_118] : memref<1x100xf32, #tpu.memory_space<vmem>>, vector<1x100xf32>
    %148 = vector.broadcast %147 : vector<1x100xf32> to vector<8x100xf32>
    %149 = arith.addf %146, %148 : vector<8x100xf32>
    %cst_119 = arith.constant 0.000000e+00 : f32
    %150 = vector.broadcast %cst_119 : f32 to vector<8x100xf32>
    %151 = arith.maximumf %149, %150 : vector<8x100xf32>
    %152 = arith.truncf %151 : vector<8x100xf32> to vector<8x100xbf16>
    %153 = vector.extract_strided_slice %152 {offsets = [0, 0], sizes = [2, 100], strides = [1, 1]} : vector<8x100xbf16> to vector<2x100xbf16>
    %154 = vector.extract_strided_slice %152 {offsets = [2, 0], sizes = [2, 100], strides = [1, 1]} : vector<8x100xbf16> to vector<2x100xbf16>
    %c0_120 = arith.constant 0 : index
    %c0_121 = arith.constant 0 : index
    %155 = vector.load %arg9[%c0_120, %c0_121] : memref<100x128xbf16, #tpu.memory_space<vmem>>, vector<100x128xbf16>
    %cst_122 = arith.constant dense<0.000000e+00> : vector<2x128xf32>
    %156 = tpu.matmul %153, %155, %cst_122 {dimension_numbers = #tpu.dot_dimension_numbers<[1], [0], [0], [1], [0, 0, 1, 1], [], []>} : vector<2x100xbf16>, vector<100x128xbf16>, vector<2x128xf32> -> vector<2x128xf32>
    %c0_123 = arith.constant 0 : index
    %c0_124 = arith.constant 0 : index
    %157 = vector.load %arg10[%c0_123, %c0_124] : memref<100x128xbf16, #tpu.memory_space<vmem>>, vector<100x128xbf16>
    %cst_125 = arith.constant dense<0.000000e+00> : vector<2x128xf32>
    %158 = tpu.matmul %154, %157, %cst_125 {dimension_numbers = #tpu.dot_dimension_numbers<[1], [0], [0], [1], [0, 0, 1, 1], [], []>} : vector<2x100xbf16>, vector<100x128xbf16>, vector<2x128xf32> -> vector<2x128xf32>
    %159 = arith.addf %156, %158 : vector<2x128xf32>
    %c0_126 = arith.constant 0 : index
    %c0_127 = arith.constant 0 : index
    %160 = vector.load %arg11[%c0_126, %c0_127] : memref<1x128xf32, #tpu.memory_space<vmem>>, vector<1x128xf32>
    %161 = vector.broadcast %160 : vector<1x128xf32> to vector<2x128xf32>
    %162 = arith.addf %159, %161 : vector<2x128xf32>
    %cst_128 = arith.constant 0.000000e+00 : f32
    %163 = vector.broadcast %cst_128 : f32 to vector<2x128xf32>
    %164 = arith.maximumf %162, %163 : vector<2x128xf32>
    %165 = arith.truncf %164 : vector<2x128xf32> to vector<2x128xbf16>
    %c0_129 = arith.constant 0 : index
    %c0_130 = arith.constant 0 : index
    %166 = vector.load %arg12[%c0_129, %c0_130] : memref<128x199xbf16, #tpu.memory_space<vmem>>, vector<128x199xbf16>
    %cst_131 = arith.constant dense<0.000000e+00> : vector<2x199xf32>
    %167 = tpu.matmul %165, %166, %cst_131 {dimension_numbers = #tpu.dot_dimension_numbers<[1], [0], [0], [1], [0, 0, 1, 1], [], []>} : vector<2x128xbf16>, vector<128x199xbf16>, vector<2x199xf32> -> vector<2x199xf32>
    %c0_132 = arith.constant 0 : index
    %c0_133 = arith.constant 0 : index
    %168 = vector.load %arg13[%c0_132, %c0_133] : memref<1x199xf32, #tpu.memory_space<vmem>>, vector<1x199xf32>
    %169 = vector.broadcast %168 : vector<1x199xf32> to vector<2x199xf32>
    %170 = arith.addf %167, %169 : vector<2x199xf32>
    %c0_134 = arith.constant 0 : index
    %c0_135 = arith.constant 0 : index
    %171 = vector.load %arg14[%c0_134, %c0_135] : memref<2x199xf32, #tpu.memory_space<vmem>>, vector<2x199xf32>
    tpu.vector_store %arg14[%c0_134, %c0_135], %170 {strides = array<i32>} : memref<2x199xf32, #tpu.memory_space<vmem>>, vector<2x199xf32>,
    return
  }
}

</mosaic_0001>

<bundles_post_ra>
// kernel: separate_baseline_multi_forward.1
= control target key start
LH: loop header
LB: loop body
LE: loop exit
PB: predicated region body
PF: predicated region fallthrough
CT: control target
= control target key end

     0   :  { %vm243_vm0 = vcmask 97280   ;;  %vm268_vm1 = vcmask 1045504   ;;  %s7133_s0 = inlined_call_operand.vmem [shape: bf16[4,128,140], index: 0, kind: input, shape index: {}]   ;;  %s7134_s1 = inlined_call_operand.vmem [shape: bf16[140,144], index: 1, kind: input, shape index: {}]   ;;  %s7135_s2 = inlined_call_operand.vmem [shape: bf16[5,72,128], index: 2, kind: input, shape index: {}]   ;;  %s7136_s3 = inlined_call_operand.vmem [shape: bf16[3,64,128], index: 3, kind: input, shape index: {}]   ;;  %s7137_s4 = inlined_call_operand.vmem [shape: bf16[64,64], index: 4, kind: input, shape index: {}]   ;;  %s7138_s5 = inlined_call_operand.vmem [shape: bf16[8,64,100], index: 5, kind: input, shape index: {}]   ;;  %s7139_s6 = inlined_call_operand.vmem [shape: f32[1,72], index: 6, kind: input, shape index: {}]   ;;  %s7140_s7 = inlined_call_operand.vmem [shape: f32[1,64], index: 7, kind: input, shape index: {}]   ;;  %s7141_s8 = inlined_call_operand.vmem [shape: f32[1,100], index: 8, kind: input, shape index: {}]   ;;  %s7142_s9 = inlined_call_operand.vmem [shape: bf16[100,128], index: 9, kind: input, shape index: {}]   ;;  %s7143_s10 = inlined_call_operand.vmem [shape: bf16[100,128], index: 10, kind: input, shape index: {}]   ;;  %s7144_s11 = inlined_call_operand.vmem [shape: f32[1,128], index: 11, kind: input, shape index: {}]   ;;  %s7145_s12 = inlined_call_operand.vmem [shape: bf16[128,199], index: 12, kind: input, shape index: {}]   ;;  %s7146_s13 = inlined_call_operand.vmem [shape: f32[1,199], index: 13, kind: input, shape index: {}]   ;;  %s7147_s14 = inlined_call_operand.hbm [shape: f32[2,199], index: 14, kind: output, shape index: {}]  }
   0x1   :  { %v5749_v0 = vld [vmem:[%s7134_s1 + $0x4] ss:$8 sps:$4 sm:$0xff]   ;;  %v5754_v1 = vld [vmem:[%s7134_s1] ss:$8 sps:$4 sm:$0xff]   ;;  %v5761_v2 = vld [vmem:[%s7134_s1 + $0x14] ss:$8 sps:$4 sm:$0xff]  }
   0x2   :  { %275 = vmatprep.subr.bf16.mxu0 %v5749_v0  ;;  %501 = vmatprep.subr.bf16.mxu1 %v5749_v0  ;;  %v5768_v3 = vld [vmem:[%s7134_s1 + $0x10] ss:$8 sps:$4 sm:$0xff]   ;;  %v5775_v4 = vld [vmem:[%s7134_s1 + $0x24] ss:$8 sps:$4 sm:$0xff]   ;;  %v5782_v5 = vld [vmem:[%s7134_s1 + $0x20] ss:$8 sps:$4 sm:$0xff]  }
   0x3   :  { %276 = vmatpush1.bf16.msra.mxu0 %v5754_v1  ;;  %502 = vmatpush1.bf16.msra.mxu1 %v5754_v1  ;;  %v5789_v6 = vld [vmem:[%s7134_s1 + $0x34] ss:$8 sps:$4 sm:$0xff]   ;;  %v5796_v7 = vld [vmem:[%s7134_s1 + $0x30] ss:$8 sps:$4 sm:$0xff]   ;;  %v5803_v8 = vld [vmem:[%s7134_s1 + $0x44] ss:$8 sps:$4 sm:$0xff]  }
   0x4   :  { %277 = vmatprep.subr.bf16.mxu0 %v5761_v2  ;;  %503 = vmatprep.subr.bf16.mxu1 %v5761_v2  ;;  %v5435_v9 = vld [vmem:[%s7133_s0 + $0x4] ss:$8 sps:$4 sm:$0xff]   ;;  %v5816_v11 = vld [vmem:[%s7134_s1 + $0x40] ss:$8 sps:$4 sm:$0xff]   ;;  %v5823_v12 = vld [vmem:[%s7134_s1 + $0x54] ss:$8 sps:$4 sm:$0xff]  }
   0x5   :  { %v5438_v10 = vld [vmem:[%s7133_s0 + $0x84] ss:$8 sps:$4 sm:$0xff]   ;;  %4227 = vmatprep.mubr.msk.bf16.mxu0 %vm243_vm0, %v5435_v9  ;;  %v5832_v13 = vld [vmem:[%s7134_s1 + $0x50] ss:$8 sps:$4 sm:$0xff]   ;;  %v5846_v15 = vld [vmem:[%s7134_s1 + $0x60] ss:$8 sps:$4 sm:$0xff]  }
   0x6   :  { %4268 = vmatprep.mubr.msk.bf16.mxu1 %vm243_vm0, %v5438_v10  ;;  %v5839_v14 = vld [vmem:[%s7134_s1 + $0x64] ss:$8 sps:$4 sm:$0xff]   ;;  %v5853_v16 = vld [vmem:[%s7134_s1 + $0x74] ss:$8 sps:$4 sm:$0xff]   ;;  %v5860_v17 = vld [vmem:[%s7134_s1 + $0x70] ss:$8 sps:$4 sm:$0xff]  }
   0x7   :  { %278 = vmatpush1.bf16.msra.mxu0 %v5768_v3  ;;  %504 = vmatpush1.bf16.msra.mxu1 %v5768_v3  ;;  %v5865_v18 = vld [vmem:[%s7134_s1 + $0x84] ss:$8 sps:$4 sm:$0x3f]   ;;  %v5432_v19 = vld [vmem:[%s7134_s1 + $0x80] ss:$8 sps:$4 sm:$0x3f]  }
   0x8   :  { %279 = vmatprep.subr.bf16.mxu0 %v5775_v4  ;;  %505 = vmatprep.subr.bf16.mxu1 %v5775_v4  ;;  %v5879_v20 = vsel %vm268_vm1, %v5432_v19, 0  ;;  %v5433_v21 = vld [vmem:[%s7133_s0] ss:$8 sps:$4 sm:$0xff]   ;;  %v5439_v23 = vld [vmem:[%s7133_s0 + $0x14] ss:$8 sps:$4 sm:$0xff]  }
   0x9   :  { %v5436_v22 = vld [vmem:[%s7133_s0 + $0x80] ss:$8 sps:$4 sm:$0xff]   ;;  %v5441_v24 = vld [vmem:[%s7133_s0 + $0x94] ss:$8 sps:$4 sm:$0xff]   ;;  %v5443_v25 = vld [vmem:[%s7133_s0 + $0x10] ss:$8 sps:$4 sm:$0xff]  }
   0xa   :  { %v5444_v26 = vld [vmem:[%s7133_s0 + $0x90] ss:$8 sps:$4 sm:$0xff]   ;;  %v5445_v27 = vld [vmem:[%s7133_s0 + $0x24] ss:$8 sps:$4 sm:$0xff]   ;;  %v5449_v29 = vld [vmem:[%s7133_s0 + $0x20] ss:$8 sps:$4 sm:$0xff]  }
   0xb   :  { %280 = vmatpush1.bf16.msra.mxu0 %v5782_v5  ;;  %506 = vmatpush1.bf16.msra.mxu1 %v5782_v5  ;;  %v5447_v28 = vld [vmem:[%s7133_s0 + $0xa4] ss:$8 sps:$4 sm:$0xff]   ;;  %v5450_v30 = vld [vmem:[%s7133_s0 + $0xa0] ss:$8 sps:$4 sm:$0xff]   ;;  %v5451_v31 = vld [vmem:[%s7133_s0 + $0x34] ss:$8 sps:$4 sm:$0xff]  }
   0xc   :  { %281 = vmatprep.subr.bf16.mxu0 %v5789_v6  ;;  %507 = vmatprep.subr.bf16.mxu1 %v5789_v6  ;;  %v5453_v32 = vld [vmem:[%s7133_s0 + $0xb4] ss:$8 sps:$4 sm:$0xff]   ;;  %v5455_v33 = vld [vmem:[%s7133_s0 + $0x30] ss:$8 sps:$4 sm:$0xff]   ;;  %v5457_v35 = vld [vmem:[%s7133_s0 + $0x44] ss:$8 sps:$4 sm:$0xff]  }
   0xd   :  { %v5456_v34 = vld [vmem:[%s7133_s0 + $0xb0] ss:$8 sps:$4 sm:$0xff]   ;;  %v5459_v36 = vld [vmem:[%s7133_s0 + $0xc4] ss:$8 sps:$4 sm:$0xff]   ;;  %v5461_v37 = vld [vmem:[%s7133_s0 + $0x40] ss:$8 sps:$4 sm:$0xff]  }
   0xe   :  { %v5462_v38 = vld [vmem:[%s7133_s0 + $0xc0] ss:$8 sps:$4 sm:$0xff]   ;;  %v5463_v39 = vld [vmem:[%s7133_s0 + $0x54] ss:$8 sps:$4 sm:$0xff]   ;;  %v5467_v41 = vld [vmem:[%s7133_s0 + $0x50] ss:$8 sps:$4 sm:$0xff]  }
   0xf   :  { %282 = vmatpush1.bf16.msra.mxu0 %v5796_v7  ;;  %508 = vmatpush1.bf16.msra.mxu1 %v5796_v7  ;;  %v5465_v40 = vld [vmem:[%s7133_s0 + $0xd4] ss:$8 sps:$4 sm:$0xff]   ;;  %v5468_v42 = vld [vmem:[%s7133_s0 + $0xd0] ss:$8 sps:$4 sm:$0xff]   ;;  %v5469_v43 = vld [vmem:[%s7133_s0 + $0x64] ss:$8 sps:$4 sm:$0xff]  }
  0x10   :  { %283 = vmatprep.subr.bf16.mxu0 %v5803_v8  ;;  %509 = vmatprep.subr.bf16.mxu1 %v5803_v8  ;;  %v5471_v44 = vld [vmem:[%s7133_s0 + $0xe4] ss:$8 sps:$4 sm:$0xff]   ;;  %v5473_v45 = vld [vmem:[%s7133_s0 + $0x60] ss:$8 sps:$4 sm:$0xff]   ;;  %v5475_v47 = vld [vmem:[%s7133_s0 + $0x74] ss:$8 sps:$4 sm:$0xff]  }
  0x11   :  { %v5474_v46 = vld [vmem:[%s7133_s0 + $0xe0] ss:$8 sps:$4 sm:$0xff]   ;;  %v5477_v48 = vld [vmem:[%s7133_s0 + $0xf4] ss:$8 sps:$4 sm:$0xff]   ;;  %v5479_v49 = vld [vmem:[%s7133_s0 + $0x70] ss:$8 sps:$4 sm:$0xff]  }
  0x12   :  { %v5480_v50 = vld [vmem:[%s7133_s0 + $0xf0] ss:$8 sps:$4 sm:$0xff]   ;;  %v5483_v51 = vld [vmem:[%s7133_s0 + $0x104] ss:$8 sps:$4 sm:$0xff]   ;;  %v5481_v53 = vld [vmem:[%s7133_s0 + $0x100] ss:$8 sps:$4 sm:$0xff]  }
  0x13   :  { %284 = vmatpush1.bf16.msra.mxu0 %v5816_v11  ;;  %510 = vmatpush1.bf16.msra.mxu1 %v5816_v11  ;;  %v5486_v52 = vld [vmem:[%s7133_s0 + $0x184] ss:$8 sps:$4 sm:$0xff]   ;;  %v5484_v54 = vld [vmem:[%s7133_s0 + $0x180] ss:$8 sps:$4 sm:$0xff]   ;;  %v5487_v55 = vld [vmem:[%s7133_s0 + $0x114] ss:$8 sps:$4 sm:$0xff]  }
  0x14   :  { %285 = vmatprep.subr.bf16.mxu0 %v5823_v12  ;;  %511 = vmatprep.subr.bf16.mxu1 %v5823_v12  ;;  %v5489_v56 = vld [vmem:[%s7133_s0 + $0x194] ss:$8 sps:$4 sm:$0xff]   ;;  %v5491_v57 = vld [vmem:[%s7133_s0 + $0x110] ss:$8 sps:$4 sm:$0xff]   ;;  %v5493_v59 = vld [vmem:[%s7133_s0 + $0x124] ss:$8 sps:$4 sm:$0xff]  }
  0x15   :  { %v5492_v58 = vld [vmem:[%s7133_s0 + $0x190] ss:$8 sps:$4 sm:$0xff]   ;;  %v5495_v60 = vld [vmem:[%s7133_s0 + $0x1a4] ss:$8 sps:$4 sm:$0xff]   ;;  %v5497_v61 = vld [vmem:[%s7133_s0 + $0x120] ss:$8 sps:$4 sm:$0xff]  }
  0x16   :  { %v5498_v62 = vld [vmem:[%s7133_s0 + $0x1a0] ss:$8 sps:$4 sm:$0xff]   ;;  %v5499_v63 = vld [vmem:[%s7133_s0 + $0x134] ss:$8 sps:$4 sm:$0xff]  }
  0x17   :  { %286 = vmatpush1.bf16.msra.mxu0 %v5832_v13  ;;  %512 = vmatpush1.bf16.msra.mxu1 %v5832_v13 }
  0x18   :  { %287 = vmatprep.subr.bf16.mxu0 %v5839_v14  ;;  %513 = vmatprep.subr.bf16.mxu1 %v5839_v14 }
  0x1b   :  { %288 = vmatpush1.bf16.msra.mxu0 %v5846_v15  ;;  %514 = vmatpush1.bf16.msra.mxu1 %v5846_v15 }
  0x1c   :  { %289 = vmatprep.subr.bf16.mxu0 %v5853_v16  ;;  %515 = vmatprep.subr.bf16.mxu1 %v5853_v16 }
  0x1f   :  { %290 = vmatpush1.bf16.msra.mxu0 %v5860_v17  ;;  %516 = vmatpush1.bf16.msra.mxu1 %v5860_v17 }
  0x20   :  { %4226 = vmatprep.subr.msk.bf16.mxu0 %vm268_vm1, %v5865_v18  ;;  %4267 = vmatprep.subr.msk.bf16.mxu1 %vm268_vm1, %v5865_v18 }
  0x23   :  { %292 = vmatpush1.bf16.msra.mxu0 %v5879_v20  ;;  %518 = vmatpush1.bf16.msra.mxu1 %v5879_v20 }
  0x24   :  { %951 = vmatprep.subr.bf16.mxu0 %v5749_v0  ;;  %1177 = vmatprep.subr.bf16.mxu1 %v5749_v0  ;;  %v5501_v0 = vld [vmem:[%s7133_s0 + $0x1b4] ss:$8 sps:$4 sm:$0xff]  }
  0x26   :  { %308 = vmatmul.mubr.bf16.vlgmr.msra.gmra.mrb[0].mxu0 %v5433_v21  ;;  %534 = vmatmul.mubr.bf16.vlgmr.msra.gmra.mrb[0].mxu1 %v5436_v22 }
  0x27   :  { %952 = vmatpush1.bf16.msra.mxu0 %v5754_v1  ;;  %1178 = vmatpush1.bf16.msra.mxu1 %v5754_v1 }
  0x28   :  { %4228 = vmatprep.mubr.msk.bf16.mxu0 %vm243_vm0, %v5439_v23  ;;  %4269 = vmatprep.mubr.msk.bf16.mxu1 %vm243_vm0, %v5441_v24 }
  0x29   :  { %953 = vmatprep.subr.bf16.mxu0 %v5761_v2  ;;  %1179 = vmatprep.subr.bf16.mxu1 %v5761_v2 }
  0x2b   :  { %954 = vmatpush1.bf16.msra.mxu0 %v5768_v3  ;;  %1180 = vmatpush1.bf16.msra.mxu1 %v5768_v3 }
  0x2c   :  { %955 = vmatprep.subr.bf16.mxu0 %v5775_v4  ;;  %1181 = vmatprep.subr.bf16.mxu1 %v5775_v4 }
  0x2e   :  { %318 = vmatmul.mubr.bf16.gmra.mrb[4].mxu0 %v5443_v25  ;;  %544 = vmatmul.mubr.bf16.gmra.mrb[4].mxu1 %v5444_v26 }
  0x2f   :  { %4229 = vmatprep.mubr.msk.bf16.mxu0 %vm243_vm0, %v5445_v27  ;;  %4270 = vmatprep.mubr.msk.bf16.mxu1 %vm243_vm0, %v5447_v28 }
  0x30   :  { %956 = vmatpush1.bf16.msra.mxu0 %v5782_v5  ;;  %1182 = vmatpush1.bf16.msra.mxu1 %v5782_v5 }
  0x31   :  { %957 = vmatprep.subr.bf16.mxu0 %v5789_v6  ;;  %1183 = vmatprep.subr.bf16.mxu1 %v5789_v6 }
  0x34   :  { %958 = vmatpush1.bf16.msra.mxu0 %v5796_v7  ;;  %1184 = vmatpush1.bf16.msra.mxu1 %v5796_v7 }
  0x35   :  { %959 = vmatprep.subr.bf16.mxu0 %v5803_v8  ;;  %1185 = vmatprep.subr.bf16.mxu1 %v5803_v8 }
  0x36   :  { %328 = vmatmul.mubr.bf16.gmra.mrb[8].mxu0 %v5449_v29  ;;  %554 = vmatmul.mubr.bf16.gmra.mrb[8].mxu1 %v5450_v30 }
  0x37   :  { %4230 = vmatprep.mubr.msk.bf16.mxu0 %vm243_vm0, %v5451_v31  ;;  %4271 = vmatprep.mubr.msk.bf16.mxu1 %vm243_vm0, %v5453_v32 }
  0x38   :  { %960 = vmatpush1.bf16.msra.mxu0 %v5816_v11  ;;  %1186 = vmatpush1.bf16.msra.mxu1 %v5816_v11 }
  0x39   :  { %961 = vmatprep.subr.bf16.mxu0 %v5823_v12  ;;  %1187 = vmatprep.subr.bf16.mxu1 %v5823_v12 }
  0x3c   :  { %962 = vmatpush1.bf16.msra.mxu0 %v5832_v13  ;;  %1188 = vmatpush1.bf16.msra.mxu1 %v5832_v13 }
  0x3d   :  { %963 = vmatprep.subr.bf16.mxu0 %v5839_v14  ;;  %1189 = vmatprep.subr.bf16.mxu1 %v5839_v14 }
  0x3e   :  { %338 = vmatmul.mubr.bf16.gmra.mrb[12].mxu0 %v5455_v33  ;;  %564 = vmatmul.mubr.bf16.gmra.mrb[12].mxu1 %v5456_v34 }
  0x3f   :  { %4231 = vmatprep.mubr.msk.bf16.mxu0 %vm243_vm0, %v5457_v35  ;;  %4272 = vmatprep.mubr.msk.bf16.mxu1 %vm243_vm0, %v5459_v36 }
  0x40   :  { %964 = vmatpush1.bf16.msra.mxu0 %v5846_v15  ;;  %1190 = vmatpush1.bf16.msra.mxu1 %v5846_v15 }
  0x41   :  { %965 = vmatprep.subr.bf16.mxu0 %v5853_v16  ;;  %1191 = vmatprep.subr.bf16.mxu1 %v5853_v16 }
  0x44   :  { %966 = vmatpush1.bf16.msra.mxu0 %v5860_v17  ;;  %1192 = vmatpush1.bf16.msra.mxu1 %v5860_v17 }
  0x45   :  { %4309 = vmatprep.subr.msk.bf16.mxu0 %vm268_vm1, %v5865_v18  ;;  %4350 = vmatprep.subr.msk.bf16.mxu1 %vm268_vm1, %v5865_v18 }
  0x46   :  { %348 = vmatmul.mubr.bf16.gmra.mrb[16].mxu0 %v5461_v37  ;;  %574 = vmatmul.mubr.bf16.gmra.mrb[16].mxu1 %v5462_v38 }
  0x47   :  { %4232 = vmatprep.mubr.msk.bf16.mxu0 %vm243_vm0, %v5463_v39  ;;  %4273 = vmatprep.mubr.msk.bf16.mxu1 %vm243_vm0, %v5465_v40 }
  0x48   :  { %968 = vmatpush1.bf16.msra.mxu0 %v5879_v20  ;;  %1194 = vmatpush1.bf16.msra.mxu1 %v5879_v20 }
  0x4e   :  { %358 = vmatmul.mubr.bf16.gmra.mrb[20].mxu0 %v5467_v41  ;;  %584 = vmatmul.mubr.bf16.gmra.mrb[20].mxu1 %v5468_v42 }
  0x4f   :  { %4233 = vmatprep.mubr.msk.bf16.mxu0 %vm243_vm0, %v5469_v43  ;;  %4274 = vmatprep.mubr.msk.bf16.mxu1 %vm243_vm0, %v5471_v44 }
  0x56   :  { %368 = vmatmul.mubr.bf16.gmra.mrb[24].mxu0 %v5473_v45  ;;  %594 = vmatmul.mubr.bf16.gmra.mrb[24].mxu1 %v5474_v46 }
  0x57   :  { %4234 = vmatprep.mubr.msk.bf16.mxu0 %vm243_vm0, %v5475_v47  ;;  %4275 = vmatprep.mubr.msk.bf16.mxu1 %vm243_vm0, %v5477_v48 }
  0x5e   :  { %378 = vmatmul.mubr.bf16.gmra.mrb[28].mxu0 %v5479_v49  ;;  %604 = vmatmul.mubr.bf16.gmra.mrb[28].mxu1 %v5480_v50 }
  0x5f   :  { %4310 = vmatprep.mubr.msk.bf16.mxu0 %vm243_vm0, %v5483_v51  ;;  %4351 = vmatprep.mubr.msk.bf16.mxu1 %vm243_vm0, %v5486_v52 }
  0x66   :  { %984 = vmatmul.mubr.bf16.vlgmr.msra.gmra.mrb[32].mxu0 %v5481_v53  ;;  %1210 = vmatmul.mubr.bf16.vlgmr.msra.gmra.mrb[32].mxu1 %v5484_v54 }
  0x67   :  { %4311 = vmatprep.mubr.msk.bf16.mxu0 %vm243_vm0, %v5487_v55  ;;  %4352 = vmatprep.mubr.msk.bf16.mxu1 %vm243_vm0, %v5489_v56 }
  0x6e   :  { %994 = vmatmul.mubr.bf16.gmra.mrb[36].mxu0 %v5491_v57  ;;  %1220 = vmatmul.mubr.bf16.gmra.mrb[36].mxu1 %v5492_v58 }
  0x6f   :  { %4312 = vmatprep.mubr.msk.bf16.mxu0 %vm243_vm0, %v5493_v59  ;;  %4353 = vmatprep.mubr.msk.bf16.mxu1 %vm243_vm0, %v5495_v60 }
  0x70   :  { %19 = vsyncpa [#allocation3], 0  ;;  %v5503_v1 = vld [vmem:[%s7133_s0 + $0x130] ss:$8 sps:$4 sm:$0xff]   ;;  %v5505_v3 = vld [vmem:[%s7133_s0 + $0x144] ss:$8 sps:$4 sm:$0xff]  }
  0x71   :  { %v5504_v2 = vld [vmem:[%s7133_s0 + $0x1b0] ss:$8 sps:$4 sm:$0xff]   ;;  %v5507_v4 = vld [vmem:[%s7133_s0 + $0x1c4] ss:$8 sps:$4 sm:$0xff]   ;;  %v5509_v5 = vld [vmem:[%s7133_s0 + $0x140] ss:$8 sps:$4 sm:$0xff]  }
  0x72   :  { %v5510_v6 = vld [vmem:[%s7133_s0 + $0x1c0] ss:$8 sps:$4 sm:$0xff]   ;;  %v5511_v7 = vld [vmem:[%s7133_s0 + $0x154] ss:$8 sps:$4 sm:$0xff]   ;;  %v5515_v9 = vld [vmem:[%s7133_s0 + $0x150] ss:$8 sps:$4 sm:$0xff]  }
  0x73   :  { %v5513_v8 = vld [vmem:[%s7133_s0 + $0x1d4] ss:$8 sps:$4 sm:$0xff]   ;;  %v5516_v10 = vld [vmem:[%s7133_s0 + $0x1d0] ss:$8 sps:$4 sm:$0xff]   ;;  %v5517_v11 = vld [vmem:[%s7133_s0 + $0x164] ss:$8 sps:$4 sm:$0xff]  }
  0x74   :  { %v5519_v12 = vld [vmem:[%s7133_s0 + $0x1e4] ss:$8 sps:$4 sm:$0xff]   ;;  %v5521_v13 = vld [vmem:[%s7133_s0 + $0x160] ss:$8 sps:$4 sm:$0xff]   ;;  %v5523_v15 = vld [vmem:[%s7133_s0 + $0x174] ss:$8 sps:$4 sm:$0xff]  }
  0x75   :  { %v5522_v14 = vld [vmem:[%s7133_s0 + $0x1e0] ss:$8 sps:$4 sm:$0xff]   ;;  %v5525_v16 = vld [vmem:[%s7133_s0 + $0x1f4] ss:$8 sps:$4 sm:$0xff]   ;;  %v5527_v17 = vld [vmem:[%s7133_s0 + $0x170] ss:$8 sps:$4 sm:$0xff]  }
  0x76   :  { %1004 = vmatmul.mubr.bf16.gmra.mrb[40].mxu0 %v5497_v61  ;;  %1230 = vmatmul.mubr.bf16.gmra.mrb[40].mxu1 %v5498_v62  ;;  %v5528_v18 = vld [vmem:[%s7133_s0 + $0x1f0] ss:$8 sps:$4 sm:$0xff]   ;;  %s5664_s25 = smov 56   ;;  %vm742_vm2 = vcmask 457728   ;;  %vm2077_vm3 = vcmask 1043456   ;;  %vm2064_vm4 = vcmask 588800  }
  0x77   :  { %4313 = vmatprep.mubr.msk.bf16.mxu0 %vm243_vm0, %v5499_v63  ;;  %4354 = vmatprep.mubr.msk.bf16.mxu1 %vm243_vm0, %v5501_v0  ;;  %vm3092_vm5 = vcmask 523264   ;;  %vm5667_vm6 = vmmov 0   ;;  %vm3876_vm7 = vcmask 1041408   ;;  %vm3872_vm8 = vcmask 818176  }
  0x78   :  { %vm4175_vm9 = vcmask 576514  }
  0x79   :  { %vm4176_vm10 = vmor %vm4175_vm9, %vm3876_vm7 }
  0x7e   :  { %1014 = vmatmul.mubr.bf16.gmra.mrb[44].mxu0 %v5503_v1  ;;  %1240 = vmatmul.mubr.bf16.gmra.mrb[44].mxu1 %v5504_v2 }
  0x7f   :  { %4314 = vmatprep.mubr.msk.bf16.mxu0 %vm243_vm0, %v5505_v3  ;;  %4355 = vmatprep.mubr.msk.bf16.mxu1 %vm243_vm0, %v5507_v4 }
  0x86   :  { %1024 = vmatmul.mubr.bf16.gmra.mrb[48].mxu0 %v5509_v5  ;;  %1250 = vmatmul.mubr.bf16.gmra.mrb[48].mxu1 %v5510_v6 }
  0x87   :  { %4315 = vmatprep.mubr.msk.bf16.mxu0 %vm243_vm0, %v5511_v7  ;;  %4356 = vmatprep.mubr.msk.bf16.mxu1 %vm243_vm0, %v5513_v8 }
  0x8e   :  { %1034 = vmatmul.mubr.bf16.gmra.mrb[52].mxu0 %v5515_v9  ;;  %1260 = vmatmul.mubr.bf16.gmra.mrb[52].mxu1 %v5516_v10 }
  0x8f   :  { %4316 = vmatprep.mubr.msk.bf16.mxu0 %vm243_vm0, %v5517_v11  ;;  %4357 = vmatprep.mubr.msk.bf16.mxu1 %vm243_vm0, %v5519_v12 }
  0x96   :  { %1044 = vmatmul.mubr.bf16.gmra.mrb[56].mxu0 %v5521_v13  ;;  %1270 = vmatmul.mubr.bf16.gmra.mrb[56].mxu1 %v5522_v14 }
  0x97   :  { %4317 = vmatprep.mubr.msk.bf16.mxu0 %vm243_vm0, %v5523_v15  ;;  %4358 = vmatprep.mubr.msk.bf16.mxu1 %vm243_vm0, %v5525_v16 }
  0x9e   :  { %1054 = vmatmul.mubr.bf16.gmra.mrb[60].mxu0 %v5527_v17  ;;  %1280 = vmatmul.mubr.bf16.gmra.mrb[60].mxu1 %v5528_v18 }
  0xf9   :  { %v309_v19 = vpop.f32.mrb[0].mxu0  ;;  %v535_v20 = vpop.f32.mrb[0].mxu1 }
  0xfa   :  { %v6137_v21 = vmax.f32 %v309_v19, %v535_v20  ;;  %v311_v22 = vpop.f32.mrb[1].mxu0  ;;  %v537_v23 = vpop.f32.mrb[1].mxu1 }
  0xfb   :  { %v615_v24 = vmax.f32 %v311_v22, %v537_v23  ;;  %v313_v25 = vpop.f32.mrb[2].mxu0  ;;  %v539_v26 = vpop.f32.mrb[2].mxu1 }
  0xfc   :  { %v6139_v27 = vmax.f32 %v313_v25, %v539_v26  ;;  %v541_v28 = vpop.f32.mrb[3].mxu1  ;;  %678 = vrot.lane.b32.xlu0 %v6137_v21, %s5664_s25  ;;  %v315_v29 = vpop.f32.mrb[3].mxu0 }
  0xfd   :  { %v617_v30 = vmax.f32 %v315_v29, %v541_v28 }
  0xfe   :  { %682 = vrot.lane.b32.xlu1 %v6139_v27, %s5664_s25 }
 0x100   :  { %680 = vrot.lane.b32.xlu0 %v615_v24, %s5664_s25 }
 0x101   :  { %v319_v31 = vpop.f32.mrb[4].mxu0  ;;  %v545_v32 = vpop.f32.mrb[4].mxu1 }
 0x102   :  { %v6146_v33 = vmax.f32 %v319_v31, %v545_v32  ;;  %v547_v34 = vpop.f32.mrb[5].mxu1  ;;  %684 = vrot.lane.b32.xlu1 %v617_v30, %s5664_s25  ;;  %v321_v35 = vpop.f32.mrb[5].mxu0 }
 0x103   :  { %v619_v36 = vmax.f32 %v321_v35, %v547_v34  ;;  %v323_v37 = vpop.f32.mrb[6].mxu0  ;;  %v549_v38 = vpop.f32.mrb[6].mxu1 }
 0x104   :  { %v6149_v39 = vmax.f32 %v323_v37, %v549_v38  ;;  %v551_v40 = vpop.f32.mrb[7].mxu1  ;;  %686 = vrot.lane.b32.xlu0 %v6146_v33, %s5664_s25  ;;  %v325_v41 = vpop.f32.mrb[7].mxu0 }
 0x105   :  { %v621_v42 = vmax.f32 %v325_v41, %v551_v40 }
 0x106   :  { %688 = vrot.lane.b32.xlu1 %v619_v36, %s5664_s25 }
 0x108   :  { %690 = vrot.lane.b32.xlu0 %v6149_v39, %s5664_s25 }
 0x109   :  { %v329_v43 = vpop.f32.mrb[8].mxu0  ;;  %v555_v44 = vpop.f32.mrb[8].mxu1 }
 0x10a   :  { %v6156_v45 = vmax.f32 %v329_v43, %v555_v44  ;;  %v557_v46 = vpop.f32.mrb[9].mxu1  ;;  %692 = vrot.lane.b32.xlu1 %v621_v42, %s5664_s25  ;;  %v331_v47 = vpop.f32.mrb[9].mxu0 }
 0x10b   :  { %v623_v48 = vmax.f32 %v331_v47, %v557_v46  ;;  %v333_v49 = vpop.f32.mrb[10].mxu0  ;;  %v559_v50 = vpop.f32.mrb[10].mxu1 }
 0x10c   :  { %v6159_v51 = vmax.f32 %v333_v49, %v559_v50  ;;  %v561_v52 = vpop.f32.mrb[11].mxu1  ;;  %694 = vrot.lane.b32.xlu0 %v6156_v45, %s5664_s25  ;;  %v335_v53 = vpop.f32.mrb[11].mxu0 }
 0x10d   :  { %v625_v54 = vmax.f32 %v335_v53, %v561_v52 }
 0x10e   :  { %696 = vrot.lane.b32.xlu1 %v623_v48, %s5664_s25 }
 0x110   :  { %698 = vrot.lane.b32.xlu0 %v6159_v51, %s5664_s25 }
 0x111   :  { %v339_v55 = vpop.f32.mrb[12].mxu0  ;;  %v565_v56 = vpop.f32.mrb[12].mxu1 }
 0x112   :  { %v6166_v57 = vmax.f32 %v339_v55, %v565_v56  ;;  %v567_v58 = vpop.f32.mrb[13].mxu1  ;;  %700 = vrot.lane.b32.xlu1 %v625_v54, %s5664_s25  ;;  %v341_v59 = vpop.f32.mrb[13].mxu0 }
 0x113   :  { %v627_v60 = vmax.f32 %v341_v59, %v567_v58  ;;  %v343_v61 = vpop.f32.mrb[14].mxu0  ;;  %v569_v62 = vpop.f32.mrb[14].mxu1 }
 0x114   :  { %v6169_v63 = vmax.f32 %v343_v61, %v569_v62  ;;  %v571_v0 = vpop.f32.mrb[15].mxu1  ;;  %702 = vrot.lane.b32.xlu0 %v6166_v57, %s5664_s25  ;;  %v345_v1 = vpop.f32.mrb[15].mxu0 }
 0x115   :  { %v629_v2 = vmax.f32 %v345_v1, %v571_v0 }
 0x116   :  { %704 = vrot.lane.b32.xlu1 %v627_v60, %s5664_s25  ;;  %v5529_v60 = vld [vmem:[%s7136_s3] sm:$0xff]  }
 0x117   :  { %4869 = vmatprep.mubr.bf16.mxu0 %v5529_v60  ;;  %4893 = vmatprep.mubr.bf16.mxu1 %v5529_v60 }
 0x118   :  { %706 = vrot.lane.b32.xlu0 %v6169_v63, %s5664_s25 }
 0x119   :  { %v349_v3 = vpop.f32.mrb[16].mxu0  ;;  %v575_v4 = vpop.f32.mrb[16].mxu1 }
 0x11a   :  { %v6176_v5 = vmax.f32 %v349_v3, %v575_v4  ;;  %v577_v6 = vpop.f32.mrb[17].mxu1  ;;  %708 = vrot.lane.b32.xlu1 %v629_v2, %s5664_s25  ;;  %v351_v7 = vpop.f32.mrb[17].mxu0 }
 0x11b   :  { %v631_v8 = vmax.f32 %v351_v7, %v577_v6  ;;  %v353_v9 = vpop.f32.mrb[18].mxu0  ;;  %v579_v10 = vpop.f32.mrb[18].mxu1 }
 0x11c   :  { %v6179_v11 = vmax.f32 %v353_v9, %v579_v10  ;;  %v581_v12 = vpop.f32.mrb[19].mxu1  ;;  %710 = vrot.lane.b32.xlu0 %v6176_v5, %s5664_s25  ;;  %v355_v13 = vpop.f32.mrb[19].mxu0 }
 0x11d   :  { %v633_v14 = vmax.f32 %v355_v13, %v581_v12 }
 0x11e   :  { %712 = vrot.lane.b32.xlu1 %v631_v8, %s5664_s25 }
 0x120   :  { %714 = vrot.lane.b32.xlu0 %v6179_v11, %s5664_s25 }
 0x121   :  { %v359_v15 = vpop.f32.mrb[20].mxu0  ;;  %v585_v16 = vpop.f32.mrb[20].mxu1 }
 0x122   :  { %v6186_v17 = vmax.f32 %v359_v15, %v585_v16  ;;  %v587_v18 = vpop.f32.mrb[21].mxu1  ;;  %716 = vrot.lane.b32.xlu1 %v633_v14, %s5664_s25  ;;  %v361_v19 = vpop.f32.mrb[21].mxu0 }
 0x123   :  { %v635_v20 = vmax.f32 %v361_v19, %v587_v18  ;;  %v363_v22 = vpop.f32.mrb[22].mxu0  ;;  %v589_v23 = vpop.f32.mrb[22].mxu1 }
 0x124   :  { %v6189_v24 = vmax.f32 %v363_v22, %v589_v23  ;;  %v591_v25 = vpop.f32.mrb[23].mxu1  ;;  %718 = vrot.lane.b32.xlu0 %v6186_v17, %s5664_s25  ;;  %v365_v26 = vpop.f32.mrb[23].mxu0 }
 0x125   :  { %v637_v28 = vmax.f32 %v365_v26, %v591_v25 }
 0x126   :  { %720 = vrot.lane.b32.xlu1 %v635_v20, %s5664_s25 }
 0x128   :  { %722 = vrot.lane.b32.xlu0 %v6189_v24, %s5664_s25 }
 0x129   :  { %v369_v29 = vpop.f32.mrb[24].mxu0  ;;  %v595_v30 = vpop.f32.mrb[24].mxu1 }
 0x12a   :  { %v6196_v31 = vmax.f32 %v369_v29, %v595_v30  ;;  %v597_v32 = vpop.f32.mrb[25].mxu1  ;;  %724 = vrot.lane.b32.xlu1 %v637_v28, %s5664_s25  ;;  %v371_v34 = vpop.f32.mrb[25].mxu0 }
 0x12b   :  { %v639_v35 = vmax.f32 %v371_v34, %v597_v32  ;;  %v373_v36 = vpop.f32.mrb[26].mxu0  ;;  %v599_v37 = vpop.f32.mrb[26].mxu1 }
 0x12c   :  { %v6199_v38 = vmax.f32 %v373_v36, %v599_v37  ;;  %v601_v40 = vpop.f32.mrb[27].mxu1  ;;  %726 = vrot.lane.b32.xlu0 %v6196_v31, %s5664_s25  ;;  %v375_v41 = vpop.f32.mrb[27].mxu0 }
 0x12d   :  { %v641_v42 = vmax.f32 %v375_v41, %v601_v40 }
 0x12e   :  { %728 = vrot.lane.b32.xlu1 %v639_v35, %s5664_s25 }
 0x130   :  { %730 = vrot.lane.b32.xlu0 %v6199_v38, %s5664_s25 }
 0x131   :  { %v379_v43 = vpop.f32.mrb[28].mxu0  ;;  %v605_v44 = vpop.f32.mrb[28].mxu1 }
 0x132   :  { %v6206_v46 = vmax.f32 %v379_v43, %v605_v44  ;;  %v607_v47 = vpop.f32.mrb[29].mxu1  ;;  %732 = vrot.lane.b32.xlu1 %v641_v42, %s5664_s25  ;;  %v381_v48 = vpop.f32.mrb[29].mxu0 }
 0x133   :  { %v643_v49 = vmax.f32 %v381_v48, %v607_v47  ;;  %v383_v50 = vpop.f32.mrb[30].mxu0  ;;  %v609_v52 = vpop.f32.mrb[30].mxu1 }
 0x134   :  { %v6209_v53 = vmax.f32 %v383_v50, %v609_v52  ;;  %v611_v54 = vpop.f32.mrb[31].mxu1  ;;  %734 = vrot.lane.b32.xlu0 %v6206_v46, %s5664_s25  ;;  %v385_v55 = vpop.f32.mrb[31].mxu0 }
 0x135   :  { %v645_v56 = vmax.f32 %v385_v55, %v611_v54 }
 0x136   :  { %736 = vrot.lane.b32.xlu1 %v643_v49, %s5664_s25 }
 0x138   :  { %738 = vrot.lane.b32.xlu0 %v6209_v53, %s5664_s25 }
 0x139   :  { %v985_v58 = vpop.f32.mrb[32].mxu0  ;;  %v1211_v59 = vpop.f32.mrb[32].mxu1 }
 0x13a   :  { %v6219_v61 = vmax.f32 %v985_v58, %v1211_v59  ;;  %v987_v62 = vpop.f32.mrb[33].mxu0  ;;  %v1213_v0 = vpop.f32.mrb[33].mxu1  ;;  %740 = vrot.lane.b32.xlu1 %v645_v56, %s5664_s25 }
 0x13b   :  { %v1291_v1 = vmax.f32 %v987_v62, %v1213_v0  ;;  %v989_v2 = vpop.f32.mrb[34].mxu0  ;;  %v1215_v3 = vpop.f32.mrb[34].mxu1 }
 0x13c   :  { %v6222_v4 = vmax.f32 %v989_v2, %v1215_v3  ;;  %v1217_v6 = vpop.f32.mrb[35].mxu1  ;;  %1354 = vrot.lane.b32.xlu0 %v6219_v61, %s5664_s25  ;;  %v991_v7 = vpop.f32.mrb[35].mxu0 }
 0x13d   :  { %v1293_v8 = vmax.f32 %v991_v7, %v1217_v6 }
 0x13e   :  { %1356 = vrot.lane.b32.xlu1 %v1291_v1, %s5664_s25 }
 0x140   :  { %1358 = vrot.lane.b32.xlu0 %v6222_v4, %s5664_s25 }
 0x141   :  { %v995_v9 = vpop.f32.mrb[36].mxu0  ;;  %v1221_v10 = vpop.f32.mrb[36].mxu1 }
 0x142   :  { %v6229_v12 = vmax.f32 %v995_v9, %v1221_v10  ;;  %v997_v13 = vpop.f32.mrb[37].mxu0  ;;  %v1223_v14 = vpop.f32.mrb[37].mxu1  ;;  %1360 = vrot.lane.b32.xlu1 %v1293_v8, %s5664_s25 }
 0x143   :  { %v1295_v15 = vmax.f32 %v997_v13, %v1223_v14  ;;  %v999_v16 = vpop.f32.mrb[38].mxu0  ;;  %v1225_v18 = vpop.f32.mrb[38].mxu1 }
 0x144   :  { %v6232_v19 = vmax.f32 %v999_v16, %v1225_v18  ;;  %v1227_v20 = vpop.f32.mrb[39].mxu1  ;;  %1362 = vrot.lane.b32.xlu0 %v6229_v12, %s5664_s25  ;;  %v1001_v22 = vpop.f32.mrb[39].mxu0 }
 0x145   :  { %v1297_v23 = vmax.f32 %v1001_v22, %v1227_v20 }
 0x146   :  { %1364 = vrot.lane.b32.xlu1 %v1295_v15, %s5664_s25 }
 0x148   :  { %1366 = vrot.lane.b32.xlu0 %v6232_v19, %s5664_s25 }
 0x149   :  { %v1005_v25 = vpop.f32.mrb[40].mxu0  ;;  %v1231_v26 = vpop.f32.mrb[40].mxu1 }
 0x14a   :  { %v6239_v28 = vmax.f32 %v1005_v25, %v1231_v26  ;;  %v1007_v29 = vpop.f32.mrb[41].mxu0  ;;  %v1233_v30 = vpop.f32.mrb[41].mxu1  ;;  %1368 = vrot.lane.b32.xlu1 %v1297_v23, %s5664_s25 }
 0x14b   :  { %v1299_v32 = vmax.f32 %v1007_v29, %v1233_v30  ;;  %v1009_v34 = vpop.f32.mrb[42].mxu0  ;;  %v1235_v35 = vpop.f32.mrb[42].mxu1 }
 0x14c   :  { %v6242_v36 = vmax.f32 %v1009_v34, %v1235_v35  ;;  %v1237_v37 = vpop.f32.mrb[43].mxu1  ;;  %1370 = vrot.lane.b32.xlu0 %v6239_v28, %s5664_s25  ;;  %v1011_v40 = vpop.f32.mrb[43].mxu0 }
 0x14d   :  { %v1301_v41 = vmax.f32 %v1011_v40, %v1237_v37 }
 0x14e   :  { %1372 = vrot.lane.b32.xlu1 %v1299_v32, %s5664_s25 }
 0x150   :  { %1374 = vrot.lane.b32.xlu0 %v6242_v36, %s5664_s25 }
 0x151   :  { %v1015_v42 = vpop.f32.mrb[44].mxu0  ;;  %v1241_v43 = vpop.f32.mrb[44].mxu1 }
 0x152   :  { %v6249_v44 = vmax.f32 %v1015_v42, %v1241_v43  ;;  %v1017_v47 = vpop.f32.mrb[45].mxu0  ;;  %v1243_v48 = vpop.f32.mrb[45].mxu1  ;;  %1376 = vrot.lane.b32.xlu1 %v1301_v41, %s5664_s25 }
 0x153   :  { %v1303_v49 = vmax.f32 %v1017_v47, %v1243_v48  ;;  %v1019_v50 = vpop.f32.mrb[46].mxu0  ;;  %v1245_v52 = vpop.f32.mrb[46].mxu1 }
 0x154   :  { %v6252_v54 = vmax.f32 %v1019_v50, %v1245_v52  ;;  %v1247_v55 = vpop.f32.mrb[47].mxu1  ;;  %1378 = vrot.lane.b32.xlu0 %v6249_v44, %s5664_s25  ;;  %v1021_v56 = vpop.f32.mrb[47].mxu0 }
 0x155   :  { %v1305_v58 = vmax.f32 %v1021_v56, %v1247_v55 }
 0x156   :  { %1380 = vrot.lane.b32.xlu1 %v1303_v49, %s5664_s25 }
 0x158   :  { %1382 = vrot.lane.b32.xlu0 %v6252_v54, %s5664_s25 }
 0x159   :  { %v1025_v59 = vpop.f32.mrb[48].mxu0  ;;  %v1251_v60 = vpop.f32.mrb[48].mxu1 }
 0x15a   :  { %v6259_v62 = vmax.f32 %v1025_v59, %v1251_v60  ;;  %v1027_v0 = vpop.f32.mrb[49].mxu0  ;;  %v1253_v1 = vpop.f32.mrb[49].mxu1  ;;  %1384 = vrot.lane.b32.xlu1 %v1305_v58, %s5664_s25 }
 0x15b   :  { %v1307_v2 = vmax.f32 %v1027_v0, %v1253_v1  ;;  %v1029_v3 = vpop.f32.mrb[50].mxu0  ;;  %v1255_v6 = vpop.f32.mrb[50].mxu1 }
 0x15c   :  { %v6262_v7 = vmax.f32 %v1029_v3, %v1255_v6  ;;  %v1257_v8 = vpop.f32.mrb[51].mxu1  ;;  %1386 = vrot.lane.b32.xlu0 %v6259_v62, %s5664_s25  ;;  %v1031_v9 = vpop.f32.mrb[51].mxu0  ;;  %v6296_v6 = vld [vmem:[%s7139_s6] ss:$0 sm:$0xff] }
 0x15d   :  { %v1309_v10 = vmax.f32 %v1031_v9, %v1257_v8 }
 0x15e   :  { %1388 = vrot.lane.b32.xlu1 %v1307_v2, %s5664_s25 }
 0x160   :  { %1390 = vrot.lane.b32.xlu0 %v6262_v7, %s5664_s25 }
 0x161   :  { %v1035_v13 = vpop.f32.mrb[52].mxu0  ;;  %v1261_v14 = vpop.f32.mrb[52].mxu1 }
 0x162   :  { %v6269_v15 = vmax.f32 %v1035_v13, %v1261_v14  ;;  %v1037_v16 = vpop.f32.mrb[53].mxu0  ;;  %v1263_v18 = vpop.f32.mrb[53].mxu1  ;;  %1392 = vrot.lane.b32.xlu1 %v1309_v10, %s5664_s25 }
 0x163   :  { %v1311_v20 = vmax.f32 %v1037_v16, %v1263_v18  ;;  %v1039_v22 = vpop.f32.mrb[54].mxu0  ;;  %v1265_v23 = vpop.f32.mrb[54].mxu1 }
 0x164   :  { %v6272_v25 = vmax.f32 %v1039_v22, %v1265_v23  ;;  %v1267_v26 = vpop.f32.mrb[55].mxu1  ;;  %1394 = vrot.lane.b32.xlu0 %v6269_v15, %s5664_s25  ;;  %v1041_v29 = vpop.f32.mrb[55].mxu0 }
 0x165   :  { %v1313_v30 = vmax.f32 %v1041_v29, %v1267_v26 }
 0x166   :  { %1396 = vrot.lane.b32.xlu1 %v1311_v20, %s5664_s25 }
 0x168   :  { %1398 = vrot.lane.b32.xlu0 %v6272_v25, %s5664_s25 }
 0x169   :  { %v1045_v32 = vpop.f32.mrb[56].mxu0  ;;  %v1271_v34 = vpop.f32.mrb[56].mxu1 }
 0x16a   :  { %v6279_v35 = vmax.f32 %v1045_v32, %v1271_v34  ;;  %v1047_v37 = vpop.f32.mrb[57].mxu0  ;;  %v1273_v40 = vpop.f32.mrb[57].mxu1  ;;  %1400 = vrot.lane.b32.xlu1 %v1313_v30, %s5664_s25 }
 0x16b   :  { %v1315_v41 = vmax.f32 %v1047_v37, %v1273_v40  ;;  %v1049_v42 = vpop.f32.mrb[58].mxu0  ;;  %v1275_v43 = vpop.f32.mrb[58].mxu1 }
 0x16c   :  { %v6282_v47 = vmax.f32 %v1049_v42, %v1275_v43  ;;  %v1277_v48 = vpop.f32.mrb[59].mxu1  ;;  %1402 = vrot.lane.b32.xlu0 %v6279_v35, %s5664_s25  ;;  %v1051_v49 = vpop.f32.mrb[59].mxu0 }
 0x16d   :  { %v1317_v50 = vmax.f32 %v1051_v49, %v1277_v48 }
 0x16e   :  { %v679_v52 = vpop.permute.xlu0 %678  ;;  %1404 = vrot.lane.b32.xlu1 %v1315_v41, %s5664_s25 }
 0x170   :  { %v683_v55 = vpop.permute.xlu1 %682  ;;  %1406 = vrot.lane.b32.xlu0 %v6282_v47, %s5664_s25 }
 0x171   :  { %v1055_v56 = vpop.f32.mrb[60].mxu0  ;;  %v1281_v58 = vpop.f32.mrb[60].mxu1 }
 0x172   :  { %v6289_v59 = vmax.f32 %v1055_v56, %v1281_v58  ;;  %v1283_v60 = vpop.f32.mrb[61].mxu1  ;;  %v681_v0 = vpop.permute.xlu0 %680  ;;  %1408 = vrot.lane.b32.xlu1 %v1317_v50, %s5664_s25 }
 0x173   :  { %v743_v1 = vsel %vm742_vm2, %v679_v52, %v681_v0  ;;  %v1057_v2 = vpop.f32.mrb[61].mxu0  ;;  %v1285_v3 = vpop.f32.mrb[62].mxu1 }
 0x174   :  { %v775_v8 = vmax.f32 %v6137_v21, %v743_v1  ;;  %v1319_v9 = vmax.f32 %v1057_v2, %v1283_v60  ;;  %v1059_v10 = vpop.f32.mrb[62].mxu0  ;;  %v1287_v13 = vpop.f32.mrb[63].mxu1  ;;  %1410 = vrot.lane.b32.xlu0 %v6289_v59, %s5664_s25 }
 0x175   :  { %v6301_v14 = vmax.f32 %v1059_v10, %v1285_v3  ;;  %v685_v16 = vpop.permute.xlu1 %684  ;;  %v1061_v18 = vpop.f32.mrb[63].mxu0 }
 0x176   :  { %v744_v20 = vsel %vm742_vm2, %v683_v55, %v685_v16  ;;  %v1321_v22 = vmax.f32 %v1061_v18, %v1287_v13  ;;  %v687_v23 = vpop.permute.xlu0 %686  ;;  %1412 = vrot.lane.b32.xlu1 %v1319_v9, %s5664_s25  ;;  %v798_v26 = vadd.f32 %v6296_v6, %v775_v8 }
 0x177   :  { %v776_v21 = vmax.f32 %v6139_v27, %v744_v20 }
 0x178   :  { %1414 = vrot.lane.b32.xlu0 %v6301_v14, %s5664_s25  ;;  %v814_v37 = vmax.f32 %v798_v26, 0.0 }
 0x179   :  { %v799_v29 = vadd.f32 %v6296_v6, %v776_v21  ;;  %v689_v30 = vpop.permute.xlu1 %688 }
 0x17a   :  { %v745_v32 = vsel %vm742_vm2, %v687_v23, %v689_v30  ;;  %v691_v34 = vpop.permute.xlu0 %690  ;;  %1416 = vrot.lane.b32.xlu1 %v1321_v22, %s5664_s25 }
 0x17b   :  { %v815_v40 = vmax.f32 %v799_v29, 0.0  ;;  %v777_v41 = vmax.f32 %v6146_v33, %v745_v32 }
 0x17d   :  { %v6313_v42 = vpack.c.bf16 %v815_v40, %v814_v37  ;;  %v693_v43 = vpop.permute.xlu1 %692  ;;  %v800_v49 = vadd.f32 %v6296_v6, %v777_v41 }
 0x17e   :  { %v746_v27 = vsel %vm742_vm2, %v691_v34, %v693_v43  ;;  %v695_v48 = vpop.permute.xlu0 %694 }
 0x17f   :  { %v778_v50 = vmax.f32 %v6149_v39, %v746_v27  ;;  %4853 = vmatprep.subr.bf16.mxu0 %v6313_v42  ;;  %v816_v58 = vmax.f32 %v800_v49, 0.0 }
 0x180   :  { %4854 = vmatpush3.bf16.msra.mxu0 %v6313_v42 }
 0x181   :  { %v801_v52 = vadd.f32 %v6296_v6, %v778_v50  ;;  %v697_v55 = vpop.permute.xlu1 %696 }
 0x182   :  { %v747_v56 = vsel %vm742_vm2, %v695_v48, %v697_v55  ;;  %v699_v33 = vpop.permute.xlu0 %698 }
 0x183   :  { %v817_v60 = vmax.f32 %v801_v52, 0.0  ;;  %v779_v0 = vmax.f32 %v6156_v45, %v747_v56 }
 0x185   :  { %v6323_v1 = vpack.c.bf16 %v817_v60, %v816_v58  ;;  %v701_v2 = vpop.permute.xlu1 %700  ;;  %v802_v8 = vadd.f32 %v6296_v6, %v779_v0 }
 0x186   :  { %v748_v3 = vsel %vm742_vm2, %v699_v33, %v701_v2  ;;  %v703_v39 = vpop.permute.xlu0 %702 }
 0x187   :  { %v780_v9 = vmax.f32 %v6159_v51, %v748_v3  ;;  %4855 = vmatprep.subr.bf16.mxu0 %v6323_v1  ;;  %v818_v18 = vmax.f32 %v802_v8, 0.0 }
 0x188   :  { %4856 = vmatpush3.bf16.msra.mxu0 %v6323_v1 }
 0x189   :  { %v803_v10 = vadd.f32 %v6296_v6, %v780_v9  ;;  %v705_v13 = vpop.permute.xlu1 %704 }
 0x18a   :  { %v749_v16 = vsel %vm742_vm2, %v703_v39, %v705_v13  ;;  %v707_v45 = vpop.permute.xlu0 %706 }
 0x18b   :  { %v819_v20 = vmax.f32 %v803_v10, 0.0  ;;  %v781_v22 = vmax.f32 %v6166_v57, %v749_v16 }
 0x18d   :  { %v6333_v23 = vpack.c.bf16 %v819_v20, %v818_v18  ;;  %v709_v26 = vpop.permute.xlu1 %708  ;;  %v804_v29 = vadd.f32 %v6296_v6, %v781_v22 }
 0x18e   :  { %v750_v21 = vsel %vm742_vm2, %v707_v45, %v709_v26  ;;  %v711_v51 = vpop.permute.xlu0 %710 }
 0x18f   :  { %v782_v30 = vmax.f32 %v6169_v63, %v750_v21  ;;  %4857 = vmatprep.subr.bf16.mxu0 %v6333_v23  ;;  %v820_v40 = vmax.f32 %v804_v29, 0.0 }
 0x190   :  { %4858 = vmatpush3.bf16.msra.mxu0 %v6333_v23 }
 0x191   :  { %v805_v32 = vadd.f32 %v6296_v6, %v782_v30  ;;  %v713_v34 = vpop.permute.xlu1 %712 }
 0x192   :  { %v751_v37 = vsel %vm742_vm2, %v711_v51, %v713_v34  ;;  %v715_v57 = vpop.permute.xlu0 %714 }
 0x193   :  { %v821_v41 = vmax.f32 %v805_v32, 0.0  ;;  %v783_v43 = vmax.f32 %v6176_v5, %v751_v37 }
 0x195   :  { %v6343_v27 = vpack.c.bf16 %v821_v41, %v820_v40  ;;  %v717_v48 = vpop.permute.xlu1 %716  ;;  %v806_v50 = vadd.f32 %v6296_v6, %v783_v43 }
 0x196   :  { %v752_v49 = vsel %vm742_vm2, %v715_v57, %v717_v48  ;;  %v719_v63 = vpop.permute.xlu0 %718 }
 0x197   :  { %v784_v52 = vmax.f32 %v6179_v11, %v752_v49  ;;  %4859 = vmatprep.subr.bf16.mxu0 %v6343_v27  ;;  %v822_v58 = vmax.f32 %v806_v50, 0.0 }
 0x198   :  { %4860 = vmatpush3.bf16.msra.mxu0 %v6343_v27 }
 0x199   :  { %v807_v55 = vadd.f32 %v6296_v6, %v784_v52  ;;  %v721_v56 = vpop.permute.xlu1 %720 }
 0x19a   :  { %v753_v33 = vsel %vm742_vm2, %v719_v63, %v721_v56  ;;  %v723_v5 = vpop.permute.xlu0 %722 }
 0x19b   :  { %v823_v60 = vmax.f32 %v807_v55, 0.0  ;;  %v785_v0 = vmax.f32 %v6186_v17, %v753_v33 }
 0x19d   :  { %v6353_v2 = vpack.c.bf16 %v823_v60, %v822_v58  ;;  %v725_v3 = vpop.permute.xlu1 %724  ;;  %v808_v8 = vadd.f32 %v6296_v6, %v785_v0 }
 0x19e   :  { %v754_v39 = vsel %vm742_vm2, %v723_v5, %v725_v3  ;;  %v727_v11 = vpop.permute.xlu0 %726 }
 0x19f   :  { %v786_v9 = vmax.f32 %v6189_v24, %v754_v39  ;;  %4861 = vmatprep.subr.bf16.mxu0 %v6353_v2  ;;  %v824_v45 = vmax.f32 %v808_v8, 0.0 }
 0x1a0   :  { %4862 = vmatpush3.bf16.msra.mxu0 %v6353_v2 }
 0x1a1   :  { %v809_v10 = vadd.f32 %v6296_v6, %v786_v9  ;;  %v729_v13 = vpop.permute.xlu1 %728 }
 0x1a2   :  { %v755_v16 = vsel %vm742_vm2, %v727_v11, %v729_v13  ;;  %v731_v17 = vpop.permute.xlu0 %730  ;;  %v6392_v11 = vld [vmem:[%s7136_s3 + $0x8] sm:$0xff]  }
 0x1a3   :  { %v825_v18 = vmax.f32 %v809_v10, 0.0  ;;  %v787_v20 = vmax.f32 %v6196_v31, %v755_v16 }
 0x1a5   :  { %v6363_v22 = vpack.c.bf16 %v825_v18, %v824_v45  ;;  %v733_v26 = vpop.permute.xlu1 %732  ;;  %v810_v51 = vadd.f32 %v6296_v6, %v787_v20 }
 0x1a6   :  { %v756_v21 = vsel %vm742_vm2, %v731_v17, %v733_v26  ;;  %v735_v24 = vpop.permute.xlu0 %734 }
 0x1a7   :  { %v788_v29 = vmax.f32 %v6199_v38, %v756_v21  ;;  %4863 = vmatprep.subr.bf16.mxu0 %v6363_v22  ;;  %v826_v37 = vmax.f32 %v810_v51, 0.0  ;;  %v6424_v51 = vld [vmem:[%s7136_s3 + $0x20] sm:$0xff]  }
 0x1a8   :  { %4864 = vmatpush3.bf16.msra.mxu0 %v6363_v22 }
 0x1a9   :  { %v811_v30 = vadd.f32 %v6296_v6, %v788_v29  ;;  %v737_v32 = vpop.permute.xlu1 %736 }
 0x1aa   :  { %v757_v34 = vsel %vm742_vm2, %v735_v24, %v737_v32  ;;  %v739_v31 = vpop.permute.xlu0 %738 }
 0x1ab   :  { %v827_v57 = vmax.f32 %v811_v30, 0.0  ;;  %v789_v40 = vmax.f32 %v6206_v46, %v757_v34 }
 0x1ad   :  { %v6373_v41 = vpack.c.bf16 %v827_v57, %v826_v37  ;;  %v741_v43 = vpop.permute.xlu1 %740  ;;  %v812_v49 = vadd.f32 %v6296_v6, %v789_v40 }
 0x1ae   :  { %v758_v48 = vsel %vm742_vm2, %v739_v31, %v741_v43  ;;  %v1355_v38 = vpop.permute.xlu0 %1354 }
 0x1af   :  { %v790_v63 = vmax.f32 %v6209_v53, %v758_v48  ;;  %4865 = vmatprep.subr.bf16.mxu0 %v6373_v41  ;;  %v828_v56 = vmax.f32 %v812_v49, 0.0 }
 0x1b0   :  { %4866 = vmatpush3.bf16.msra.mxu0 %v6373_v41 }
 0x1b1   :  { %v813_v50 = vadd.f32 %v6296_v6, %v790_v63  ;;  %v1357_v52 = vpop.permute.xlu1 %1356 }
 0x1b2   :  { %v1418_v55 = vsel %vm742_vm2, %v1355_v38, %v1357_v52  ;;  %v1359_v46 = vpop.permute.xlu0 %1358 }
 0x1b3   :  { %v829_v33 = vmax.f32 %v813_v50, 0.0  ;;  %v1450_v5 = vmax.f32 %v6219_v61, %v1418_v55  ;;  %v6398_v61 = vld [vmem:[%s7136_s3 + $0x10] sm:$0xff]  }
 0x1b5   :  { %v6383_v58 = vpack.c.bf16 %v829_v33, %v828_v56  ;;  %v1361_v60 = vpop.permute.xlu1 %1360  ;;  %v1466_v3 = vadd.f32 %v6296_v6, %v1450_v5 }
 0x1b6   :  { %v1419_v0 = vsel %vm742_vm2, %v1359_v46, %v1361_v60  ;;  %v1363_v53 = vpop.permute.xlu0 %1362 }
 0x1b7   :  { %v1451_v39 = vmax.f32 %v6222_v4, %v1419_v0  ;;  %4867 = vmatprep.subr.bf16.mxu0 %v6383_v58  ;;  %v1482_v13 = vmax.f32 %v1466_v3, 0.0 }
 0x1b8   :  { %4868 = vmatpush3.bf16.msra.mxu0 %v6383_v58 }
 0x1b9   :  { %v1467_v8 = vadd.f32 %v6296_v6, %v1451_v39  ;;  %4901 = vmatprep.subr.bf16.mxu0 %v6313_v42  ;;  %v1365_v9 = vpop.permute.xlu1 %1364 }
 0x1ba   :  { %v1420_v4 = vsel %vm742_vm2, %v1363_v53, %v1365_v9  ;;  %v1367_v10 = vpop.permute.xlu0 %1366 }
 0x1bb   :  { %v1483_v16 = vmax.f32 %v1467_v8, 0.0  ;;  %v1452_v17 = vmax.f32 %v6229_v12, %v1420_v4  ;;  %4870 = vmatmul.mubr.bf16.vlgmr.msra.gmra.mrb[64].mxu0 %v6392_v11  ;;  %v6417_v12 = vld [vmem:[%s7136_s3 + $0x18] sm:$0xff]  }
 0x1bc   :  { %4902 = vmatpush3.bf16.msra.mxu0 %v6313_v42  ;;  %4873 = vmatprep.mubr.bf16.mxu0 %v6398_v61 }
 0x1bd   :  { %v6407_v45 = vpack.c.bf16 %v1483_v16, %v1482_v13  ;;  %4903 = vmatprep.subr.bf16.mxu0 %v6323_v1  ;;  %v1369_v18 = vpop.permute.xlu1 %1368  ;;  %v1468_v21 = vadd.f32 %v6296_v6, %v1452_v17 }
 0x1be   :  { %v1421_v20 = vsel %vm742_vm2, %v1367_v10, %v1369_v18  ;;  %v1371_v26 = vpop.permute.xlu0 %1370 }
 0x1bf   :  { %v1453_v24 = vmax.f32 %v6232_v19, %v1421_v20  ;;  %4877 = vmatprep.subr.bf16.mxu1 %v6407_v45  ;;  %v1484_v34 = vmax.f32 %v1468_v21, 0.0 }
 0x1c0   :  { %4878 = vmatpush3.bf16.msra.mxu1 %v6407_v45  ;;  %4904 = vmatpush3.bf16.msra.mxu0 %v6323_v1 }
 0x1c1   :  { %v1469_v29 = vadd.f32 %v6296_v6, %v1453_v24  ;;  %4905 = vmatprep.subr.bf16.mxu0 %v6333_v23  ;;  %v1373_v19 = vpop.permute.xlu1 %1372 }
 0x1c2   :  { %v1422_v30 = vsel %vm742_vm2, %v1371_v26, %v1373_v19  ;;  %v1375_v32 = vpop.permute.xlu0 %1374  ;;  %v6478_v26 = vld [vmem:[%s7136_s3 + $0x30] sm:$0xff]  }
 0x1c3   :  { %v1485_v31 = vmax.f32 %v1469_v29, 0.0  ;;  %v1454_v37 = vmax.f32 %v6239_v28, %v1422_v30  ;;  %4874 = vmatmul.mubr.bf16.gmra.mrb[68].mxu0 %v6417_v12 }
 0x1c4   :  { %4906 = vmatpush3.bf16.msra.mxu0 %v6333_v23  ;;  %4917 = vmatprep.mubr.bf16.mxu0 %v6424_v51 }
 0x1c5   :  { %v6433_v57 = vpack.c.bf16 %v1485_v31, %v1484_v34  ;;  %4907 = vmatprep.subr.bf16.mxu0 %v6343_v27  ;;  %v1377_v40 = vpop.permute.xlu1 %1376  ;;  %v1470_v38 = vadd.f32 %v6296_v6, %v1454_v37 }
 0x1c6   :  { %v1423_v43 = vsel %vm742_vm2, %v1375_v32, %v1377_v40  ;;  %v1379_v48 = vpop.permute.xlu0 %1378 }
 0x1c7   :  { %v1455_v49 = vmax.f32 %v6242_v36, %v1423_v43  ;;  %4879 = vmatprep.subr.bf16.mxu1 %v6433_v57  ;;  %v1486_v55 = vmax.f32 %v1470_v38, 0.0 }
 0x1c8   :  { %4880 = vmatpush3.bf16.msra.mxu1 %v6433_v57  ;;  %4908 = vmatpush3.bf16.msra.mxu0 %v6343_v27 }
 0x1c9   :  { %v1471_v28 = vadd.f32 %v6296_v6, %v1455_v49  ;;  %4909 = vmatprep.subr.bf16.mxu0 %v6353_v2  ;;  %v1381_v63 = vpop.permute.xlu1 %1380 }
 0x1ca   :  { %v1424_v50 = vsel %vm742_vm2, %v1379_v48, %v1381_v63  ;;  %v1383_v52 = vpop.permute.xlu0 %1382 }
 0x1cb   :  { %v1487_v46 = vmax.f32 %v1471_v28, 0.0  ;;  %v1456_v56 = vmax.f32 %v6249_v44, %v1424_v50 }
 0x1cc   :  { %4910 = vmatpush3.bf16.msra.mxu0 %v6353_v2 }
 0x1cd   :  { %v6447_v36 = vpack.c.bf16 %v1487_v46, %v1486_v55  ;;  %4911 = vmatprep.subr.bf16.mxu0 %v6363_v22  ;;  %v1385_v33 = vpop.permute.xlu1 %1384  ;;  %v1472_v0 = vadd.f32 %v6296_v6, %v1456_v56 }
 0x1ce   :  { %v1425_v5 = vsel %vm742_vm2, %v1383_v52, %v1385_v33  ;;  %v1387_v60 = vpop.permute.xlu0 %1386 }
 0x1cf   :  { %v1457_v53 = vmax.f32 %v6252_v54, %v1425_v5  ;;  %4881 = vmatprep.subr.bf16.mxu1 %v6447_v36  ;;  %v1488_v9 = vmax.f32 %v1472_v0, 0.0 }
 0x1d0   :  { %4882 = vmatpush3.bf16.msra.mxu1 %v6447_v36  ;;  %4912 = vmatpush3.bf16.msra.mxu0 %v6363_v22 }
 0x1d1   :  { %v1473_v44 = vadd.f32 %v6296_v6, %v1457_v53  ;;  %4913 = vmatprep.subr.bf16.mxu0 %v6373_v41  ;;  %v1389_v3 = vpop.permute.xlu1 %1388 }
 0x1d2   :  { %v1426_v39 = vsel %vm742_vm2, %v1387_v60, %v1389_v3  ;;  %v1391_v8 = vpop.permute.xlu0 %1390 }
 0x1d3   :  { %v1489_v4 = vmax.f32 %v1473_v44, 0.0  ;;  %v1458_v10 = vmax.f32 %v6259_v62, %v1426_v39  ;;  %v6471_v62 = vld [vmem:[%s7136_s3 + $0x28] sm:$0xff]  }
 0x1d4   :  { %4914 = vmatpush3.bf16.msra.mxu0 %v6373_v41 }
 0x1d5   :  { %v6461_v54 = vpack.c.bf16 %v1489_v4, %v1488_v9  ;;  %4915 = vmatprep.subr.bf16.mxu0 %v6383_v58  ;;  %v1393_v13 = vpop.permute.xlu1 %1392  ;;  %v1474_v18 = vadd.f32 %v6296_v6, %v1458_v10 }
 0x1d6   :  { %v1427_v16 = vsel %vm742_vm2, %v1391_v8, %v1393_v13  ;;  %v1395_v17 = vpop.permute.xlu0 %1394 }
 0x1d7   :  { %v1459_v20 = vmax.f32 %v6262_v7, %v1427_v16  ;;  %4883 = vmatprep.subr.bf16.mxu1 %v6461_v54  ;;  %v1490_v19 = vmax.f32 %v1474_v18, 0.0 }
 0x1d8   :  { %4884 = vmatpush3.bf16.msra.mxu1 %v6461_v54  ;;  %4916 = vmatpush3.bf16.msra.mxu0 %v6383_v58 }
 0x1d9   :  { %v1475_v21 = vadd.f32 %v6296_v6, %v1459_v20  ;;  %4949 = vmatprep.subr.bf16.mxu0 %v6313_v42  ;;  %v1397_v7 = vpop.permute.xlu1 %1396 }
 0x1da   :  { %v1428_v24 = vsel %vm742_vm2, %v1395_v17, %v1397_v7  ;;  %v1399_v29 = vpop.permute.xlu0 %1398 }
 0x1db   :  { %v1491_v30 = vmax.f32 %v1475_v21, 0.0  ;;  %v1460_v32 = vmax.f32 %v6269_v15, %v1428_v24  ;;  %4918 = vmatmul.mubr.bf16.vlgmr.msra.gmra.mrb[72].mxu0 %v6471_v62  ;;  %v6497_v15 = vld [vmem:[%s7136_s3 + $0x38] sm:$0xff]  }
 0x1dc   :  { %4950 = vmatpush3.bf16.msra.mxu0 %v6313_v42  ;;  %4921 = vmatprep.mubr.bf16.mxu0 %v6478_v26  ;;  %v6504_v42 = vld [vmem:[%s7136_s3 + $0x40] sm:$0xff]  }
 0x1dd   :  { %v6487_v34 = vpack.c.bf16 %v1491_v30, %v1490_v19  ;;  %4951 = vmatprep.subr.bf16.mxu0 %v6323_v1  ;;  %v1401_v31 = vpop.permute.xlu1 %1400  ;;  %v1476_v43 = vadd.f32 %v6296_v6, %v1460_v32 }
 0x1de   :  { %v1429_v37 = vsel %vm742_vm2, %v1399_v29, %v1401_v31  ;;  %v1403_v40 = vpop.permute.xlu0 %1402  ;;  %v5547_v31 = vld [vmem:[%s7135_s2 + $0x8] sm:$0xff]  }
 0x1df   :  { %v1461_v48 = vmax.f32 %v6272_v25, %v1429_v37  ;;  %4885 = vmatprep.subr.bf16.mxu1 %v6487_v34  ;;  %v1492_v63 = vmax.f32 %v1476_v43, 0.0  ;;  %v5548_v43 = vld [vmem:[%s7135_s2 + $0x10] sm:$0xff]  }
 0x1e0   :  { %4886 = vmatpush3.bf16.msra.mxu1 %v6487_v34  ;;  %4952 = vmatpush3.bf16.msra.mxu0 %v6323_v1 }
 0x1e1   :  { %v1477_v38 = vadd.f32 %v6296_v6, %v1461_v48  ;;  %4953 = vmatprep.subr.bf16.mxu0 %v6333_v23  ;;  %v1405_v25 = vpop.permute.xlu1 %1404 }
 0x1e2   :  { %v1430_v49 = vsel %vm742_vm2, %v1403_v40, %v1405_v25  ;;  %v1407_v28 = vpop.permute.xlu0 %1406  ;;  %v5549_v25 = vld [vmem:[%s7135_s2 + $0x18] sm:$0xff]  }
 0x1e3   :  { %v1493_v50 = vmax.f32 %v1477_v38, 0.0  ;;  %v1462_v52 = vmax.f32 %v6279_v35, %v1430_v49  ;;  %4922 = vmatmul.mubr.bf16.gmra.mrb[76].mxu0 %v6497_v15  ;;  %v5550_v49 = vld [vmem:[%s7135_s2 + $0x20] ss:$0 sps:$4 sm:$0xff]  }
 0x1e4   :  { %4954 = vmatpush3.bf16.msra.mxu0 %v6333_v23  ;;  %4965 = vmatprep.mubr.bf16.mxu0 %v6504_v42 }
 0x1e5   :  { %v6513_v1 = vpack.c.bf16 %v1493_v50, %v1492_v63  ;;  %4955 = vmatprep.subr.bf16.mxu0 %v6343_v27  ;;  %v1409_v55 = vpop.permute.xlu1 %1408  ;;  %v1478_v56 = vadd.f32 %v6296_v6, %v1462_v52  ;;  %v6691_v63 = vld [vmem:[%s7135_s2 + $0x48] sm:$0xff]  }
 0x1e6   :  { %v1431_v46 = vsel %vm742_vm2, %v1407_v28, %v1409_v55  ;;  %v1411_v5 = vpop.permute.xlu0 %1410  ;;  %v2186_v28 = vsel %vm2077_vm3, %v5550_v49, 0 }
 0x1e7   :  { %v1463_v33 = vmax.f32 %v6282_v47, %v1431_v46  ;;  %4887 = vmatprep.subr.bf16.mxu1 %v6513_v1  ;;  %v1494_v0 = vmax.f32 %v1478_v56, 0.0 }
 0x1e8   :  { %4888 = vmatpush3.bf16.msra.mxu1 %v6513_v1  ;;  %4956 = vmatpush3.bf16.msra.mxu0 %v6343_v27 }
 0x1e9   :  { %v1479_v35 = vadd.f32 %v6296_v6, %v1463_v33  ;;  %4957 = vmatprep.subr.bf16.mxu0 %v6353_v2  ;;  %v1413_v23 = vpop.permute.xlu1 %1412 }
 0x1ea   :  { %v1432_v60 = vsel %vm742_vm2, %v1411_v5, %v1413_v23  ;;  %v1415_v3 = vpop.permute.xlu0 %1414 }
 0x1eb   :  { %v1495_v53 = vmax.f32 %v1479_v35, 0.0  ;;  %v1464_v44 = vmax.f32 %v6289_v59, %v1432_v60 }
 0x1ec   :  { %4958 = vmatpush3.bf16.msra.mxu0 %v6353_v2 }
 0x1ed   :  { %v6527_v47 = vpack.c.bf16 %v1495_v53, %v1494_v0  ;;  %4959 = vmatprep.subr.bf16.mxu0 %v6363_v22  ;;  %v1417_v39 = vpop.permute.xlu1 %1416  ;;  %v1480_v8 = vadd.f32 %v6296_v6, %v1464_v44  ;;  %v5552_v53 = vld [vmem:[%s7135_s2 + $0x50] sm:$0xff]  }
 0x1ee   :  { %v1433_v27 = vsel %vm742_vm2, %v1415_v3, %v1417_v39  ;;  %v5553_v39 = vld [vmem:[%s7135_s2 + $0x58] sm:$0xff]  }
 0x1ef   :  { %v1465_v9 = vmax.f32 %v6301_v14, %v1433_v27  ;;  %4889 = vmatprep.subr.bf16.mxu1 %v6527_v47  ;;  %v1496_v2 = vmax.f32 %v1480_v8, 0.0  ;;  %v6546_v14 = vld [vmem:[%s7136_s3 + $0x48] sm:$0xff]  }
 0x1f0   :  { %4890 = vmatpush3.bf16.msra.mxu1 %v6527_v47  ;;  %4960 = vmatpush3.bf16.msra.mxu0 %v6363_v22  ;;  %v6559_v22 = vld [vmem:[%s7136_s3 + $0x50] sm:$0xff]  }
 0x1f1   :  { %v1481_v59 = vadd.f32 %v6296_v6, %v1465_v9  ;;  %4961 = vmatprep.subr.bf16.mxu0 %v6373_v41  ;;  %v6551_v6 = vld [vmem:[%s7135_s2 + $0x24] sm:$0xff]  }
 0x1f3   :  { %v1497_v4 = vmax.f32 %v1481_v59, 0.0 }
 0x1f4   :  { %4962 = vmatpush3.bf16.msra.mxu0 %v6373_v41  ;;  %v5540_v41 = vld [vmem:[%s7136_s3 + $0x58] sm:$0xff]  }
 0x1f5   :  { %v6539_v10 = vpack.c.bf16 %v1497_v4, %v1496_v2  ;;  %4963 = vmatprep.subr.bf16.mxu0 %v6383_v58 }
 0x1f7   :  { %4891 = vmatprep.subr.bf16.mxu1 %v6539_v10 }
 0x1f8   :  { %4892 = vmatpush3.bf16.msra.mxu1 %v6539_v10  ;;  %4964 = vmatpush3.bf16.msra.mxu0 %v6383_v58  ;;  %v5542_v58 = vld [vmem:[%s7135_s2 + $0x2c] sm:$0xff]  }
 0x1f9   :  { %4925 = vmatprep.subr.bf16.mxu1 %v6407_v45  ;;  %4997 = vmatprep.subr.bf16.mxu0 %v6551_v6 }
 0x1fb   :  { %4894 = vmatmul.mubr.bf16.vlgmr.msra.gmra.mrb[64].mxu1 %v6392_v11  ;;  %4966 = vmatmul.mubr.bf16.vlgmr.msra.gmra.mrb[80].mxu0 %v6546_v14  ;;  %v5543_v11 = vld [vmem:[%s7135_s2 + $0x34] sm:$0xff]  }
 0x1fc   :  { %4926 = vmatpush3.bf16.msra.mxu1 %v6407_v45  ;;  %4897 = vmatprep.mubr.bf16.mxu1 %v6398_v61  ;;  %v5544_v61 = vld [vmem:[%s7135_s2 + $0x3c] sm:$0xff]  }
 0x1fd   :  { %4927 = vmatprep.subr.bf16.mxu1 %v6433_v57  ;;  %4969 = vmatprep.mubr.bf16.mxu0 %v6559_v22 }
 0x1fe   :  { %4998 = vmatpush3.bf16.msra.mxu0 %v6551_v6 }
 0x1ff   :  { %4999 = vmatprep.subr.bf16.mxu0 %v5542_v58 }
 0x200   :  { %4928 = vmatpush3.bf16.msra.mxu1 %v6433_v57 }
 0x201   :  { %4929 = vmatprep.subr.bf16.mxu1 %v6447_v36 }
 0x202   :  { %5000 = vmatpush3.bf16.msra.mxu0 %v5542_v58 }
 0x203   :  { %4898 = vmatmul.mubr.bf16.gmra.mrb[68].mxu1 %v6417_v12  ;;  %4970 = vmatmul.mubr.bf16.gmra.mrb[84].mxu0 %v5540_v41 }
 0x204   :  { %4930 = vmatpush3.bf16.msra.mxu1 %v6447_v36  ;;  %4941 = vmatprep.mubr.bf16.mxu1 %v6424_v51  ;;  %v6622_v51 = vld [vmem:[%s7135_s2] sm:$0xff]  }
 0x205   :  { %4931 = vmatprep.subr.bf16.mxu1 %v6461_v54  ;;  %5001 = vmatprep.subr.bf16.mxu0 %v5543_v11 }
 0x206   :  { %5002 = vmatpush3.bf16.msra.mxu0 %v5543_v11 }
 0x207   :  { %5003 = vmatprep.subr.bf16.mxu0 %v5544_v61 }
 0x208   :  { %4932 = vmatpush3.bf16.msra.mxu1 %v6461_v54 }
 0x209   :  { %4933 = vmatprep.subr.bf16.mxu1 %v6487_v34 }
 0x20a   :  { %5004 = vmatpush3.bf16.msra.mxu0 %v5544_v61 }
 0x20c   :  { %4934 = vmatpush3.bf16.msra.mxu1 %v6487_v34 }
 0x20d   :  { %4935 = vmatprep.subr.bf16.mxu1 %v6513_v1 }
 0x210   :  { %4936 = vmatpush3.bf16.msra.mxu1 %v6513_v1 }
 0x211   :  { %4937 = vmatprep.subr.bf16.mxu1 %v6527_v47 }
 0x214   :  { %4938 = vmatpush3.bf16.msra.mxu1 %v6527_v47 }
 0x215   :  { %4939 = vmatprep.subr.bf16.mxu1 %v6539_v10 }
 0x218   :  { %4940 = vmatpush3.bf16.msra.mxu1 %v6539_v10 }
 0x219   :  { %4973 = vmatprep.subr.bf16.mxu1 %v6407_v45 }
 0x21b   :  { %4942 = vmatmul.mubr.bf16.vlgmr.msra.gmra.mrb[72].mxu1 %v6471_v62 }
 0x21c   :  { %4974 = vmatpush3.bf16.msra.mxu1 %v6407_v45  ;;  %4945 = vmatprep.mubr.bf16.mxu1 %v6478_v26  ;;  %v5545_v45 = vld [vmem:[%s7135_s2 + $0x44] ss:$0 sps:$4 sm:$0xff]  }
 0x21d   :  { %4975 = vmatprep.subr.bf16.mxu1 %v6433_v57  ;;  %v2079_v12 = vsel %vm2077_vm3, %v5545_v45, 0  ;;  %5389 = vmatprep.subr.msk.bf16.mxu0 %vm2077_vm3, %v5545_v45 }
 0x21e   :  { %5006 = vmatpush3.bf16.msra.mxu0 %v2079_v12 }
 0x21f   :  { %5015 = vmatprep.subr.bf16.mxu0 %v6622_v51 }
 0x220   :  { %4976 = vmatpush3.bf16.msra.mxu1 %v6433_v57 }
 0x221   :  { %4977 = vmatprep.subr.bf16.mxu1 %v6447_v36 }
 0x223   :  { %4946 = vmatmul.mubr.bf16.gmra.mrb[76].mxu1 %v6497_v15 }
 0x224   :  { %4978 = vmatpush3.bf16.msra.mxu1 %v6447_v36  ;;  %4989 = vmatprep.mubr.bf16.mxu1 %v6504_v42 }
 0x225   :  { %4979 = vmatprep.subr.bf16.mxu1 %v6461_v54 }
 0x228   :  { %4980 = vmatpush3.bf16.msra.mxu1 %v6461_v54 }
 0x229   :  { %4981 = vmatprep.subr.bf16.mxu1 %v6487_v34 }
 0x22c   :  { %4982 = vmatpush3.bf16.msra.mxu1 %v6487_v34 }
 0x22d   :  { %4983 = vmatprep.subr.bf16.mxu1 %v6513_v1 }
 0x230   :  { %4984 = vmatpush3.bf16.msra.mxu1 %v6513_v1 }
 0x231   :  { %4985 = vmatprep.subr.bf16.mxu1 %v6527_v47 }
 0x234   :  { %4986 = vmatpush3.bf16.msra.mxu1 %v6527_v47 }
 0x235   :  { %4987 = vmatprep.subr.bf16.mxu1 %v6539_v10 }
 0x238   :  { %4988 = vmatpush3.bf16.msra.mxu1 %v6539_v10 }
 0x239   :  { %5087 = vmatprep.subr.bf16.mxu1 %v6551_v6 }
 0x23b   :  { %4990 = vmatmul.mubr.bf16.vlgmr.msra.gmra.mrb[80].mxu1 %v6546_v14 }
 0x23c   :  { %4993 = vmatprep.mubr.bf16.mxu1 %v6559_v22  ;;  %5088 = vmatpush3.bf16.msra.mxu1 %v6551_v6  ;;  %v5554_v22 = vld [vmem:[%s7135_s2 + $0x60] sm:$0xff]  }
 0x23d   :  { %5089 = vmatprep.subr.bf16.mxu1 %v5542_v58 }
 0x240   :  { %5090 = vmatpush3.bf16.msra.mxu1 %v5542_v58 }
 0x241   :  { %5091 = vmatprep.subr.bf16.mxu1 %v5543_v11 }
 0x243   :  { %4994 = vmatmul.mubr.bf16.gmra.mrb[84].mxu1 %v5540_v41  ;;  %v5555_v41 = vld [vmem:[%s7135_s2 + $0x68] ss:$0 sps:$4 sm:$0xff]  }
 0x244   :  { %5092 = vmatpush3.bf16.msra.mxu1 %v5543_v11  ;;  %v2303_v58 = vsel %vm2077_vm3, %v5555_v41, 0  ;;  %v5556_v11 = vld [vmem:[%s7135_s2 + $0x6c] sm:$0xff]  }
 0x245   :  { %5093 = vmatprep.subr.bf16.mxu1 %v5544_v61 }
 0x248   :  { %5094 = vmatpush3.bf16.msra.mxu1 %v5544_v61 }
 0x249   :  { %5394 = vmatprep.subr.msk.bf16.mxu1 %vm2077_vm3, %v5545_v45 }
 0x24c   :  { %5096 = vmatpush3.bf16.msra.mxu1 %v2079_v12 }
 0x24d   :  { %5105 = vmatprep.subr.bf16.mxu1 %v6622_v51 }
 0x28e   :  { %v6633_v57 = vpop.f32.mrb[64].mxu0 }
 0x28f   :  { %v6635_v36 = vpop.f32.mrb[65].mxu0 }
 0x290   :  { %v6637_v54 = vpop.f32.mrb[66].mxu0 }
 0x291   :  { %v1604_v13 = vpack.c.bf16 %v6637_v54, %v6633_v57  ;;  %v6641_v16 = vpop.f32.mrb[67].mxu0  ;;  %v5557_v54 = vld [vmem:[%s7135_s2 + $0x74] sm:$0xff]  }
 0x292   :  { %v1603_v17 = vpack.c.bf16 %v6641_v16, %v6635_v36 }
 0x296   :  { %v6645_v18 = vpop.f32.mrb[68].mxu0 }
 0x297   :  { %v6647_v20 = vpop.f32.mrb[69].mxu0 }
 0x298   :  { %v6649_v62 = vpop.f32.mrb[70].mxu0 }
 0x299   :  { %v1606_v26 = vpack.c.bf16 %v6649_v62, %v6645_v18  ;;  %v6653_v21 = vpop.f32.mrb[71].mxu0 }
 0x29a   :  { %v1605_v7 = vpack.c.bf16 %v6653_v21, %v6647_v20  ;;  %v5559_v21 = vld [vmem:[%s7135_s2 + $0x84] sm:$0xff]  }
 0x2ae   :  { %v4919_v24 = vpop.f32.mrb[72].mxu0 }
 0x2af   :  { %v1743_v29 = vpop.f32.mrb[73].mxu0 }
 0x2b0   :  { %v4920_v19 = vpop.f32.mrb[74].mxu0 }
 0x2b1   :  { %v6657_v30 = vpack.c.bf16 %v4920_v19, %v4919_v24  ;;  %v1746_v32 = vpop.f32.mrb[75].mxu0  ;;  %v5562_v19 = vld [vmem:[%s7135_s2 + $0x98] sm:$0xff]  }
 0x2b2   :  { %v6659_v34 = vpack.c.bf16 %v1746_v32, %v1743_v29  ;;  %v5561_v29 = vld [vmem:[%s7135_s2 + $0x90] sm:$0xff]  }
 0x2b4   :  { %5097 = vmatprep.mubr.msk.bf16.mxu1 %vm2064_vm4, %v6659_v34 }
 0x2b5   :  { %5098 = vmatmul.mubr.msk.bf16.vlgmr.msra.gmra.mrb[88].mxu1 %vm2064_vm4, %v6657_v30 }
 0x2b6   :  { %5106 = vmatpush3.bf16.msra.mxu1 %v6622_v51  ;;  %v4923_v37 = vpop.f32.mrb[76].mxu0 }
 0x2b7   :  { %5107 = vmatprep.subr.bf16.mxu1 %v5547_v31  ;;  %v1759_v40 = vpop.f32.mrb[77].mxu0 }
 0x2b8   :  { %v4924_v48 = vpop.f32.mrb[78].mxu0 }
 0x2b9   :  { %v6672_v15 = vpack.c.bf16 %v4924_v48, %v4923_v37  ;;  %v1762_v42 = vpop.f32.mrb[79].mxu0 }
 0x2ba   :  { %5108 = vmatpush3.bf16.msra.mxu1 %v5547_v31  ;;  %v6674_v38 = vpack.c.bf16 %v1762_v42, %v1759_v40 }
 0x2bb   :  { %5109 = vmatprep.subr.bf16.mxu1 %v5548_v43 }
 0x2bc   :  { %5101 = vmatprep.mubr.msk.bf16.mxu1 %vm2064_vm4, %v6674_v38 }
 0x2bd   :  { %5102 = vmatmul.mubr.msk.bf16.gmra.mrb[92].mxu1 %vm2064_vm4, %v6672_v15 }
 0x2be   :  { %5110 = vmatpush3.bf16.msra.mxu1 %v5548_v43 }
 0x2bf   :  { %5111 = vmatprep.subr.bf16.mxu1 %v5549_v25 }
 0x2c2   :  { %5112 = vmatpush3.bf16.msra.mxu1 %v5549_v25 }
 0x2c3   :  { %5395 = vmatprep.subr.msk.bf16.mxu1 %vm2077_vm3, %v5550_v49 }
 0x2c6   :  { %5114 = vmatpush3.bf16.msra.mxu1 %v2186_v28 }
 0x2c7   :  { %5123 = vmatprep.subr.bf16.mxu1 %v6691_v63 }
 0x2ce   :  { %v4895_v50 = vpop.f32.mrb[64].mxu1  ;;  %v4967_v52 = vpop.f32.mrb[80].mxu0 }
 0x2cf   :  { %v1641_v1 = vpop.f32.mrb[65].mxu1  ;;  %v1914_v55 = vpop.f32.mrb[81].mxu0 }
 0x2d0   :  { %v4896_v46 = vpop.f32.mrb[66].mxu1  ;;  %v4968_v56 = vpop.f32.mrb[82].mxu0 }
 0x2d1   :  { %v1673_v33 = vpack.c.bf16 %v4896_v46, %v4895_v50  ;;  %v1644_v5 = vpop.f32.mrb[67].mxu1  ;;  %v6694_v35 = vpack.c.bf16 %v4968_v56, %v4967_v52  ;;  %v1917_v23 = vpop.f32.mrb[83].mxu0 }
 0x2d2   :  { %v1672_v60 = vpack.c.bf16 %v1644_v5, %v1641_v1  ;;  %v6696_v0 = vpack.c.bf16 %v1917_v23, %v1914_v55 }
 0x2d4   :  { %5007 = vmatprep.mubr.msk.bf16.mxu0 %vm2064_vm4, %v1672_v60  ;;  %5115 = vmatprep.mubr.msk.bf16.mxu1 %vm2064_vm4, %v1672_v60 }
 0x2d5   :  { %5008 = vmatmul.mubr.msk.bf16.vlgmr.msra.gmra.mrb[88].mxu0 %vm2064_vm4, %v1673_v33  ;;  %5116 = vmatmul.mubr.msk.bf16.vlgmr.msra.gmra.mrb[88].mxu1 %vm2064_vm4, %v1673_v33 }
 0x2d6   :  { %5016 = vmatpush3.bf16.msra.mxu0 %v6622_v51  ;;  %v4899_v44 = vpop.f32.mrb[68].mxu1  ;;  %5124 = vmatpush3.bf16.msra.mxu1 %v6691_v63  ;;  %v4971_v47 = vpop.f32.mrb[84].mxu0 }
 0x2d7   :  { %v1657_v3 = vpop.f32.mrb[69].mxu1  ;;  %5017 = vmatprep.subr.bf16.mxu0 %v5547_v31  ;;  %5125 = vmatprep.subr.bf16.mxu1 %v5552_v53  ;;  %v1930_v27 = vpop.f32.mrb[85].mxu0 }
 0x2d8   :  { %v4900_v8 = vpop.f32.mrb[70].mxu1  ;;  %v4972_v9 = vpop.f32.mrb[86].mxu0 }
 0x2d9   :  { %v1675_v59 = vpack.c.bf16 %v4900_v8, %v4899_v44  ;;  %v1660_v2 = vpop.f32.mrb[71].mxu1  ;;  %v6710_v4 = vpack.c.bf16 %v4972_v9, %v4971_v47  ;;  %v1933_v10 = vpop.f32.mrb[87].mxu0 }
 0x2da   :  { %v1674_v14 = vpack.c.bf16 %v1660_v2, %v1657_v3  ;;  %5018 = vmatpush3.bf16.msra.mxu0 %v5547_v31  ;;  %5126 = vmatpush3.bf16.msra.mxu1 %v5552_v53  ;;  %v6712_v6 = vpack.c.bf16 %v1933_v10, %v1930_v27  ;;  %v5564_v31 = vld [vmem:[%s7135_s2 + $0xa8] sm:$0xff]  }
 0x2db   :  { %5019 = vmatprep.subr.bf16.mxu0 %v5548_v43  ;;  %5127 = vmatprep.subr.bf16.mxu1 %v5553_v39 }
 0x2dc   :  { %5011 = vmatprep.mubr.msk.bf16.mxu0 %vm2064_vm4, %v1674_v14  ;;  %5119 = vmatprep.mubr.msk.bf16.mxu1 %vm2064_vm4, %v1674_v14 }
 0x2dd   :  { %5012 = vmatmul.mubr.msk.bf16.gmra.mrb[92].mxu0 %vm2064_vm4, %v1675_v59  ;;  %5120 = vmatmul.mubr.msk.bf16.gmra.mrb[92].mxu1 %vm2064_vm4, %v1675_v59 }
 0x2de   :  { %5020 = vmatpush3.bf16.msra.mxu0 %v5548_v43  ;;  %5025 = vmatprep.mubr.msk.bf16.mxu0 %vm2064_vm4, %v1603_v17  ;;  %v5558_v17 = vld [vmem:[%s7135_s2 + $0x7c] sm:$0xff]  }
 0x2df   :  { %5021 = vmatprep.subr.bf16.mxu0 %v5549_v25  ;;  %5128 = vmatpush3.bf16.msra.mxu1 %v5553_v39 }
 0x2e0   :  { %5129 = vmatprep.subr.bf16.mxu1 %v5554_v22 }
 0x2e2   :  { %5022 = vmatpush3.bf16.msra.mxu0 %v5549_v25 }
 0x2e3   :  { %5390 = vmatprep.subr.msk.bf16.mxu0 %vm2077_vm3, %v5550_v49  ;;  %5130 = vmatpush3.bf16.msra.mxu1 %v5554_v22 }
 0x2e4   :  { %5396 = vmatprep.subr.msk.bf16.mxu1 %vm2077_vm3, %v5555_v41 }
 0x2e6   :  { %5024 = vmatpush3.bf16.msra.mxu0 %v2186_v28 }
 0x2e7   :  { %5033 = vmatprep.subr.bf16.mxu0 %v6691_v63  ;;  %5132 = vmatpush3.bf16.msra.mxu1 %v2303_v58 }
 0x2e8   :  { %5141 = vmatprep.subr.bf16.mxu1 %v5556_v11 }
 0x2e9   :  { %5026 = vmatmul.mubr.msk.bf16.vlgmr.msra.gmra.mrb[88].mxu0 %vm2064_vm4, %v1604_v13 }
 0x2ea   :  { %5029 = vmatprep.mubr.msk.bf16.mxu0 %vm2064_vm4, %v1605_v7  ;;  %5034 = vmatpush3.bf16.msra.mxu0 %v6691_v63  ;;  %v5560_v7 = vld [vmem:[%s7135_s2 + $0x8c] ss:$0 sps:$4 sm:$0xff]  }
 0x2eb   :  { %5035 = vmatprep.subr.bf16.mxu0 %v5552_v53  ;;  %v2428_v24 = vsel %vm2077_vm3, %v5560_v7, 0 }
 0x2ee   :  { %5036 = vmatpush3.bf16.msra.mxu0 %v5552_v53  ;;  %v4943_v61 = vpop.f32.mrb[72].mxu1 }
 0x2ef   :  { %v1812_v45 = vpop.f32.mrb[73].mxu1  ;;  %5037 = vmatprep.subr.bf16.mxu0 %v5553_v39 }
 0x2f0   :  { %v4944_v12 = vpop.f32.mrb[74].mxu1 }
 0x2f1   :  { %v6744_v51 = vpack.c.bf16 %v4944_v12, %v4943_v61  ;;  %5030 = vmatmul.mubr.msk.bf16.gmra.mrb[92].mxu0 %vm2064_vm4, %v1606_v26  ;;  %v1815_v57 = vpop.f32.mrb[75].mxu1 }
 0x2f2   :  { %v1843_v36 = vpack.c.bf16 %v1815_v57, %v1812_v45  ;;  %5038 = vmatpush3.bf16.msra.mxu0 %v5553_v39  ;;  %5043 = vmatprep.mubr.msk.bf16.mxu0 %vm2064_vm4, %v6659_v34 }
 0x2f3   :  { %5039 = vmatprep.subr.bf16.mxu0 %v5554_v22 }
 0x2f4   :  { %5133 = vmatprep.mubr.msk.bf16.mxu1 %vm2064_vm4, %v1843_v36 }
 0x2f5   :  { %5134 = vmatmul.mubr.msk.bf16.vlgmr.msra.gmra.mrb[88].mxu1 %vm2064_vm4, %v6744_v51 }
 0x2f6   :  { %5040 = vmatpush3.bf16.msra.mxu0 %v5554_v22  ;;  %5142 = vmatpush3.bf16.msra.mxu1 %v5556_v11  ;;  %v4947_v13 = vpop.f32.mrb[76].mxu1  ;;  %v5571_v22 = vld [vmem:[%s7138_s5 + $0x20] sm:$0xff]  }
 0x2f7   :  { %5391 = vmatprep.subr.msk.bf16.mxu0 %vm2077_vm3, %v5555_v41  ;;  %5143 = vmatprep.subr.bf16.mxu1 %v5557_v54  ;;  %v1828_v16 = vpop.f32.mrb[77].mxu1  ;;  %v5666_v41 = vmov 0.0  }
 0x2f8   :  { %v4948_v18 = vpop.f32.mrb[78].mxu1 }
 0x2f9   :  { %v6762_v20 = vpack.c.bf16 %v4948_v18, %v4947_v13  ;;  %v1831_v62 = vpop.f32.mrb[79].mxu1 }
 0x2fa   :  { %5042 = vmatpush3.bf16.msra.mxu0 %v2303_v58  ;;  %5144 = vmatpush3.bf16.msra.mxu1 %v5557_v54  ;;  %v1845_v26 = vpack.c.bf16 %v1831_v62, %v1828_v16  ;;  %v5573_v58 = vld [vmem:[%s7138_s5 + $0x28] sm:$0xff]  }
 0x2fb   :  { %5051 = vmatprep.subr.bf16.mxu0 %v5556_v11  ;;  %5145 = vmatprep.subr.bf16.mxu1 %v5558_v17 }
 0x2fc   :  { %5137 = vmatprep.mubr.msk.bf16.mxu1 %vm2064_vm4, %v1845_v26 }
 0x2fd   :  { %5044 = vmatmul.mubr.msk.bf16.vlgmr.msra.gmra.mrb[88].mxu0 %vm2064_vm4, %v6657_v30  ;;  %5138 = vmatmul.mubr.msk.bf16.gmra.mrb[92].mxu1 %vm2064_vm4, %v6762_v20  ;;  %v5563_v30 = vld [vmem:[%s7135_s2 + $0xa0] sm:$0xff]  }
 0x2fe   :  { %5047 = vmatprep.mubr.msk.bf16.mxu0 %vm2064_vm4, %v6674_v38  ;;  %5052 = vmatpush3.bf16.msra.mxu0 %v5556_v11  ;;  %v4488_v11 = vld [vmem:[%s7140_s7] ss:$0 sm:$0xff] }
 0x2ff   :  { %5146 = vmatpush3.bf16.msra.mxu1 %v5558_v17  ;;  %5053 = vmatprep.subr.bf16.mxu0 %v5557_v54 }
 0x300   :  { %5147 = vmatprep.subr.bf16.mxu1 %v5559_v21  ;;  %5151 = vmatprep.mubr.msk.bf16.mxu1 %vm2064_vm4, %v6696_v0 }
 0x302   :  { %5054 = vmatpush3.bf16.msra.mxu0 %v5557_v54 }
 0x303   :  { %5148 = vmatpush3.bf16.msra.mxu1 %v5559_v21  ;;  %5055 = vmatprep.subr.bf16.mxu0 %v5558_v17 }
 0x304   :  { %5397 = vmatprep.subr.msk.bf16.mxu1 %vm2077_vm3, %v5560_v7 }
 0x305   :  { %5048 = vmatmul.mubr.msk.bf16.gmra.mrb[92].mxu0 %vm2064_vm4, %v6672_v15  ;;  %v5565_v15 = vld [vmem:[%s7135_s2 + $0xb0] ss:$0 sps:$4 sm:$0xff]   ;;  %s5665_s2 = smov 64  }
 0x306   :  { %5056 = vmatpush3.bf16.msra.mxu0 %v5558_v17  ;;  %5061 = vmatprep.mubr.msk.bf16.mxu0 %vm2064_vm4, %v1843_v36  ;;  %v2553_v25 = vsel %vm2077_vm3, %v5565_v15, 0 }
 0x307   :  { %5150 = vmatpush3.bf16.msra.mxu1 %v2428_v24  ;;  %5057 = vmatprep.subr.bf16.mxu0 %v5559_v21 }
 0x308   :  { %5159 = vmatprep.subr.bf16.mxu1 %v5561_v29 }
 0x30a   :  { %5058 = vmatpush3.bf16.msra.mxu0 %v5559_v21  ;;  %5152 = vmatmul.mubr.msk.bf16.vlgmr.msra.gmra.mrb[88].mxu1 %vm2064_vm4, %v6694_v35 }
 0x30b   :  { %5160 = vmatpush3.bf16.msra.mxu1 %v5561_v29  ;;  %5392 = vmatprep.subr.msk.bf16.mxu0 %vm2077_vm3, %v5560_v7 }
 0x30c   :  { %5161 = vmatprep.subr.bf16.mxu1 %v5562_v19  ;;  %5155 = vmatprep.mubr.msk.bf16.mxu1 %vm2064_vm4, %v6712_v6 }
 0x30e   :  { %5060 = vmatpush3.bf16.msra.mxu0 %v2428_v24  ;;  %v4991_v32 = vpop.f32.mrb[80].mxu1 }
 0x30f   :  { %5162 = vmatpush3.bf16.msra.mxu1 %v5562_v19  ;;  %5069 = vmatprep.subr.bf16.mxu0 %v5561_v29  ;;  %v1983_v34 = vpop.f32.mrb[81].mxu1 }
 0x310   :  { %5163 = vmatprep.subr.bf16.mxu1 %v5563_v30  ;;  %v4992_v37 = vpop.f32.mrb[82].mxu1 }
 0x311   :  { %5062 = vmatmul.mubr.msk.bf16.vlgmr.msra.gmra.mrb[88].mxu0 %vm2064_vm4, %v6744_v51  ;;  %v2015_v40 = vpack.c.bf16 %v4992_v37, %v4991_v32  ;;  %v1986_v43 = vpop.f32.mrb[83].mxu1 }
 0x312   :  { %5065 = vmatprep.mubr.msk.bf16.mxu0 %vm2064_vm4, %v1845_v26  ;;  %5070 = vmatpush3.bf16.msra.mxu0 %v5561_v29  ;;  %v2014_v48 = vpack.c.bf16 %v1986_v43, %v1983_v34 }
 0x313   :  { %5164 = vmatpush3.bf16.msra.mxu1 %v5563_v30  ;;  %5071 = vmatprep.subr.bf16.mxu0 %v5562_v19 }
 0x314   :  { %5156 = vmatmul.mubr.msk.bf16.gmra.mrb[92].mxu1 %vm2064_vm4, %v6710_v4  ;;  %5165 = vmatprep.subr.bf16.mxu1 %v5564_v31 }
 0x315   :  { %5169 = vmatprep.mubr.msk.bf16.mxu1 %vm2064_vm4, %v2014_v48 }
 0x316   :  { %5072 = vmatpush3.bf16.msra.mxu0 %v5562_v19  ;;  %v4995_v42 = vpop.f32.mrb[84].mxu1 }
 0x317   :  { %5166 = vmatpush3.bf16.msra.mxu1 %v5564_v31  ;;  %5073 = vmatprep.subr.bf16.mxu0 %v5563_v30  ;;  %v1999_v38 = vpop.f32.mrb[85].mxu1 }
 0x318   :  { %5398 = vmatprep.subr.msk.bf16.mxu1 %vm2077_vm3, %v5565_v15  ;;  %v4996_v49 = vpop.f32.mrb[86].mxu1 }
 0x319   :  { %5066 = vmatmul.mubr.msk.bf16.gmra.mrb[92].mxu0 %vm2064_vm4, %v6762_v20  ;;  %v2017_v28 = vpack.c.bf16 %v4996_v49, %v4995_v42  ;;  %v2002_v63 = vpop.f32.mrb[87].mxu1 }
 0x31a   :  { %5074 = vmatpush3.bf16.msra.mxu0 %v5563_v30  ;;  %5079 = vmatprep.mubr.msk.bf16.mxu0 %vm2064_vm4, %v6696_v0  ;;  %v2016_v50 = vpack.c.bf16 %v2002_v63, %v1999_v38 }
 0x31b   :  { %5168 = vmatpush3.bf16.msra.mxu1 %v2553_v25  ;;  %5075 = vmatprep.subr.bf16.mxu0 %v5564_v31 }
 0x31c   :  { %5193 = vmatprep.subr.bf16.mxu1 %v5666_v41 }
 0x31e   :  { %5170 = vmatmul.mubr.msk.bf16.vlgmr.msra.gmra.mrb[88].mxu1 %vm2064_vm4, %v2015_v40  ;;  %5076 = vmatpush3.bf16.msra.mxu0 %v5564_v31 }
 0x31f   :  { %5393 = vmatprep.subr.msk.bf16.mxu0 %vm2077_vm3, %v5565_v15  ;;  %5173 = vmatprep.mubr.msk.bf16.mxu1 %vm2064_vm4, %v2016_v50 }
 0x320   :  { %5194 = vmatpush3.bf16.msra.mxu1 %v5571_v22 }
 0x321   :  { %5195 = vmatprep.subr.bf16.mxu1 %v5666_v41 }
 0x322   :  { %5078 = vmatpush3.bf16.msra.mxu0 %v2553_v25 }
 0x324   :  { %5196 = vmatpush3.bf16.msra.mxu1 %v5573_v58 }
 0x325   :  { %5080 = vmatmul.mubr.msk.bf16.vlgmr.msra.gmra.mrb[88].mxu0 %vm2064_vm4, %v6694_v35  ;;  %5197 = vmatprep.subr.bf16.mxu1 %v5666_v41 }
 0x326   :  { %5174 = vmatmul.mubr.msk.bf16.gmra.mrb[92].mxu1 %vm2064_vm4, %v2017_v28  ;;  %5083 = vmatprep.mubr.msk.bf16.mxu0 %vm2064_vm4, %v6712_v6  ;;  %v5566_v6 = vld [vmem:[%s7137_s4] sm:$0xff]  }
 0x327   :  { %5201 = vmatprep.mubr.msk.bf16.mxu1 %vm5667_vm6, %v5666_v41 }
 0x32d   :  { %5084 = vmatmul.mubr.msk.bf16.gmra.mrb[92].mxu0 %vm2064_vm4, %v6710_v4 }
 0x32e   :  { %5185 = vmatprep.mubr.msk.bf16.mxu0 %vm3092_vm5, %v5566_v6  ;;  %v5582_v6 = vld [vmem:[%s7138_s5 + $0x70] sm:$0xff]  }
 0x3f1   :  { %v5171_v52 = vpop.f32.mrb[88].mxu1 }
 0x3f2   :  { %v2950_v1 = vpop.f32.mrb[89].mxu1 }
 0x3f3   :  { %v5172_v55 = vpop.f32.mrb[90].mxu1 }
 0x3f4   :  { %v2953_v46 = vpop.f32.mrb[91].mxu1 }
 0x3f8   :  { %v5081_v56 = vpop.f32.mrb[88].mxu0 }
 0x3f9   :  { %v2991_v33 = vmax.f32 %v5081_v56, %v5171_v52  ;;  %v5175_v5 = vpop.f32.mrb[92].mxu1  ;;  %v2589_v23 = vpop.f32.mrb[89].mxu0  ;;  %v5572_v56 = vld [vmem:[%s7138_s5 + $0x8] sm:$0xff]  }
 0x3fa   :  { %v2989_v60 = vmax.f32 %v2589_v23, %v2950_v1  ;;  %v2966_v0 = vpop.f32.mrb[93].mxu1  ;;  %v5082_v53 = vpop.f32.mrb[90].mxu0  ;;  %v5567_v1 = vld [vmem:[%s7137_s4 + $0x8] sm:$0xff]   ;;  %v5575_v23 = vld [vmem:[%s7138_s5 + $0x30] sm:$0xff]  }
 0x3fb   :  { %v2992_v35 = vmax.f32 %v5082_v53, %v5172_v55  ;;  %v5176_v44 = vpop.f32.mrb[94].mxu1  ;;  %v2592_v47 = vpop.f32.mrb[91].mxu0  ;;  %v5568_v55 = vld [vmem:[%s7137_s4 + $0x10] sm:$0xff]   ;;  %5198 = vmatpush3.bf16.msra.mxu1 %v5575_v23 }
 0x3fc   :  { %v2990_v3 = vmax.f32 %v2592_v47, %v2953_v46  ;;  %v2969_v39 = vpop.f32.mrb[95].mxu1  ;;  %3005 = vrot.lane.b32.xlu0 %v2989_v60, %s5665_s2  ;;  %v5570_v46 = vld [vmem:[%s7138_s5] sm:$0xff]   ;;  %5199 = vmatprep.subr.bf16.mxu1 %v5666_v41 }
 0x3fe   :  { %3007 = vrot.lane.b32.xlu1 %v2990_v3, %s5665_s2 }
 0x400   :  { %3009 = vrot.lane.b32.xlu0 %v2991_v33, %s5665_s2  ;;  %v5085_v27 = vpop.f32.mrb[92].mxu0 }
 0x401   :  { %v2995_v8 = vmax.f32 %v5085_v27, %v5175_v5  ;;  %v2605_v9 = vpop.f32.mrb[93].mxu0  ;;  %v5574_v5 = vld [vmem:[%s7138_s5 + $0x10] sm:$0xff]  }
 0x402   :  { %v2993_v59 = vmax.f32 %v2605_v9, %v2966_v0  ;;  %3011 = vrot.lane.b32.xlu1 %v2992_v35, %s5665_s2  ;;  %v5086_v2 = vpop.f32.mrb[94].mxu0  ;;  %v5577_v0 = vld [vmem:[%s7138_s5 + $0x38] sm:$0xff]  }
 0x403   :  { %v2996_v4 = vmax.f32 %v5086_v2, %v5176_v44  ;;  %v2608_v10 = vpop.f32.mrb[95].mxu0  ;;  %5200 = vmatpush3.bf16.msra.mxu1 %v5577_v0 }
 0x404   :  { %v2994_v14 = vmax.f32 %v2608_v10, %v2969_v39  ;;  %3013 = vrot.lane.b32.xlu0 %v2993_v59, %s5665_s2  ;;  %5217 = vmatprep.subr.bf16.mxu1 %v5666_v41  ;;  %v5578_v39 = vld [vmem:[%s7138_s5 + $0x60] sm:$0xff]  }
 0x406   :  { %3015 = vrot.lane.b32.xlu1 %v2994_v14, %s5665_s2 }
 0x408   :  { %3017 = vrot.lane.b32.xlu0 %v2995_v8, %s5665_s2 }
 0x40a   :  { %3019 = vrot.lane.b32.xlu1 %v2996_v4, %s5665_s2 }
 0x46e   :  { %v3006_v61 = vpop.permute.xlu0 %3005 }
 0x46f   :  { %v3029_v45 = vmax.f32 %v2989_v60, %v3006_v61  ;;  %v5576_v60 = vld [vmem:[%s7138_s5 + $0x18] sm:$0xff]   ;;  %v5583_v61 = vld [vmem:[%s7138_s5 + $0x50] sm:$0xff]  }
 0x470   :  { %v3008_v12 = vpop.permute.xlu1 %3007 }
 0x471   :  { %v3044_v51 = vadd.f32 %v4488_v11, %v3029_v45  ;;  %v3030_v57 = vmax.f32 %v2990_v3, %v3008_v12  ;;  %v5584_v45 = vld [vmem:[%s7138_s5 + $0x78] sm:$0xff]  }
 0x472   :  { %v3010_v36 = vpop.permute.xlu0 %3009  ;;  %v5585_v12 = vld [vmem:[%s7138_s5 + $0x58] sm:$0xff]  }
 0x473   :  { %v3045_v54 = vadd.f32 %v4488_v11, %v3030_v57  ;;  %v3031_v13 = vmax.f32 %v2991_v33, %v3010_v36  ;;  %v3052_v17 = vmax.f32 %v3044_v51, 0.0  ;;  %v5569_v33 = vld [vmem:[%s7137_s4 + $0x18] sm:$0xff]   ;;  %v5586_v51 = vld [vmem:[%s7138_s5 + $0xa0] sm:$0xff]  }
 0x474   :  { %v3012_v16 = vpop.permute.xlu1 %3011  ;;  %v5587_v36 = vld [vmem:[%s7138_s5 + $0x80] sm:$0xff]  }
 0x475   :  { %v3053_v18 = vmax.f32 %v3045_v54, 0.0  ;;  %v3046_v20 = vadd.f32 %v4488_v11, %v3031_v13  ;;  %v3032_v62 = vmax.f32 %v2992_v35, %v3012_v16  ;;  %v5588_v54 = vld [vmem:[%s7138_s5 + $0xa8] sm:$0xff]   ;;  %v5590_v16 = vld [vmem:[%s7138_s5 + $0xb0] sm:$0xff]  }
 0x476   :  { %v3014_v26 = vpop.permute.xlu0 %3013  ;;  %v5589_v13 = vld [vmem:[%s7138_s5 + $0x88] sm:$0xff]  }
 0x477   :  { %v3047_v21 = vadd.f32 %v4488_v11, %v3032_v62  ;;  %v3033_v7 = vmax.f32 %v2993_v59, %v3014_v26  ;;  %v3060_v24 = vpack.c.bf16 %v3053_v18, %v3052_v17  ;;  %v3054_v19 = vmax.f32 %v3046_v20, 0.0  ;;  %v5580_v59 = vld [vmem:[%s7138_s5 + $0x68] sm:$0xff]   ;;  %v5591_v17 = vld [vmem:[%s7138_s5 + $0x90] sm:$0xff]   ;;  %v5592_v18 = vld [vmem:[%s7138_s5 + $0xb8] sm:$0xff]  }
 0x478   :  { %v3016_v29 = vpop.permute.xlu1 %3015  ;;  %v5593_v20 = vld [vmem:[%s7138_s5 + $0x98] sm:$0xff]   ;;  %v5594_v26 = vld [vmem:[%s7138_s5 + $0xe0] sm:$0xff]  }
 0x479   :  { %v3055_v30 = vmax.f32 %v3047_v21, 0.0  ;;  %v3048_v32 = vadd.f32 %v4488_v11, %v3033_v7  ;;  %v3034_v34 = vmax.f32 %v2994_v14, %v3016_v29  ;;  %5177 = vmatprep.subr.bf16.mxu0 %v3060_v24  ;;  %v5595_v21 = vld [vmem:[%s7138_s5 + $0xc0] sm:$0xff]   ;;  %v5596_v7 = vld [vmem:[%s7138_s5 + $0xe8] sm:$0xff]   ;;  %v5598_v29 = vld [vmem:[%s7138_s5 + $0xf0] sm:$0xff]  }
 0x47a   :  { %5178 = vmatpush3.bf16.msra.mxu0 %v3060_v24  ;;  %v3018_v31 = vpop.permute.xlu0 %3017  ;;  %v5597_v24 = vld [vmem:[%s7138_s5 + $0xc8] sm:$0xff]  }
 0x47b   :  { %v3049_v37 = vadd.f32 %v4488_v11, %v3034_v34  ;;  %v3035_v40 = vmax.f32 %v2995_v8, %v3018_v31  ;;  %v3061_v43 = vpack.c.bf16 %v3055_v30, %v3054_v19  ;;  %v3056_v15 = vmax.f32 %v3048_v32, 0.0  ;;  %v5579_v8 = vld [vmem:[%s7138_s5 + $0x40] sm:$0xff]   ;;  %v5599_v19 = vld [vmem:[%s7138_s5 + $0xd0] sm:$0xff]   ;;  %v5600_v30 = vld [vmem:[%s7138_s5 + $0xf8] sm:$0xff]  }
 0x47c   :  { %v3020_v48 = vpop.permute.xlu1 %3019  ;;  %v5601_v32 = vld [vmem:[%s7138_s5 + $0xd8] sm:$0xff]   ;;  %v5602_v31 = vld [vmem:[%s7142_s9] sm:$0xff]  }
 0x47d   :  { %v3057_v42 = vmax.f32 %v3049_v37, 0.0  ;;  %v3050_v38 = vadd.f32 %v4488_v11, %v3035_v40  ;;  %v3036_v25 = vmax.f32 %v2996_v4, %v3020_v48  ;;  %5179 = vmatprep.subr.bf16.mxu0 %v3061_v43  ;;  %v5581_v4 = vld [vmem:[%s7138_s5 + $0x48] sm:$0xff]   ;;  %v5603_v37 = vld [vmem:[%s7143_s10] sm:$0xff]   ;;  %v5606_v48 = vld [vmem:[%s7142_s9 + $0x10] sm:$0xff]  }
 0x47e   :  { %5180 = vmatpush3.bf16.msra.mxu0 %v3061_v43  ;;  %v5604_v40 = vld [vmem:[%s7142_s9 + $0x8] sm:$0xff]  }
 0x47f   :  { %v3051_v49 = vadd.f32 %v4488_v11, %v3036_v25  ;;  %v3062_v28 = vpack.c.bf16 %v3057_v42, %v3056_v15  ;;  %v3058_v63 = vmax.f32 %v3050_v38, 0.0  ;;  %v5605_v43 = vld [vmem:[%s7143_s10 + $0x8] sm:$0xff]   ;;  %v5607_v15 = vld [vmem:[%s7143_s10 + $0x10] sm:$0xff]   ;;  %v5608_v42 = vld [vmem:[%s7142_s9 + $0x18] sm:$0xff]  }
 0x480   :  { %v5609_v38 = vld [vmem:[%s7143_s10 + $0x18] sm:$0xff]   ;;  %v5610_v25 = vld [vmem:[%s7142_s9 + $0x20] sm:$0xff]  }
 0x481   :  { %v3059_v50 = vmax.f32 %v3051_v49, 0.0  ;;  %5181 = vmatprep.subr.bf16.mxu0 %v3062_v28  ;;  %v5611_v49 = vld [vmem:[%s7143_s10 + $0x20] sm:$0xff]  }
 0x482   :  { %5182 = vmatpush3.bf16.msra.mxu0 %v3062_v28  ;;  %v5612_v28 = vld [vmem:[%s7142_s9 + $0x28] sm:$0xff]  }
 0x483   :  { %v3063_v52 = vpack.c.bf16 %v3059_v50, %v3058_v63  ;;  %v5613_v63 = vld [vmem:[%s7143_s10 + $0x28] sm:$0xff]   ;;  %v5614_v50 = vld [vmem:[%s7142_s9 + $0x30] ss:$0 sps:$4 sm:$0x33]  }
 0x485   :  { %5183 = vmatprep.subr.bf16.mxu0 %v3063_v52 }
 0x486   :  { %5184 = vmatpush3.bf16.msra.mxu0 %v3063_v52  ;;  %v3963_v52 = vsel %vm3876_vm7, %v5614_v50, 0  ;;  %v5668_v50 = vmov 0  }
 0x487   :  { %5205 = vmatprep.subr.bf16.mxu0 %v5666_v41 }
 0x489   :  { %5186 = vmatmul.mubr.msk.bf16.vlgmr.msra.gmra.mrb[96].mxu0 %vm3092_vm5, %v5567_v1  ;;  %v5615_v1 = vld [vmem:[%s7143_s10 + $0x30] ss:$0 sps:$4 sm:$0x33]  }
 0x48a   :  { %5189 = vmatprep.mubr.msk.bf16.mxu0 %vm3092_vm5, %v5568_v55  ;;  %5206 = vmatpush3.bf16.msra.mxu0 %v5570_v46  ;;  %v3878_v55 = vsel %vm3876_vm7, %v5615_v1, 0  ;;  %v5618_v46 = vld [vmem:[%s7145_s12 + $0x4] ss:$8 sps:$4 sm:$0xff]  }
 0x48b   :  { %5207 = vmatprep.subr.bf16.mxu0 %v5666_v41 }
 0x48e   :  { %5208 = vmatpush3.bf16.msra.mxu0 %v5572_v56 }
 0x48f   :  { %5209 = vmatprep.subr.bf16.mxu0 %v5666_v41 }
 0x491   :  { %5190 = vmatmul.mubr.msk.bf16.gmra.mrb[100].mxu0 %vm3092_vm5, %v5569_v33 }
 0x492   :  { %5210 = vmatpush3.bf16.msra.mxu0 %v5574_v5  ;;  %5213 = vmatprep.mubr.msk.bf16.mxu0 %vm5667_vm6, %v5666_v41 }
 0x493   :  { %5211 = vmatprep.subr.bf16.mxu0 %v5666_v41 }
 0x496   :  { %5212 = vmatpush3.bf16.msra.mxu0 %v5576_v60 }
 0x497   :  { %5229 = vmatprep.subr.bf16.mxu0 %v5666_v41 }
 0x55c   :  { %v5187_v53 = vpop.f32.mrb[96].mxu0 }
 0x55d   :  { %v3139_v35 = vpop.f32.mrb[97].mxu0 }
 0x55e   :  { %v5188_v44 = vpop.f32.mrb[98].mxu0 }
 0x55f   :  { %v3171_v47 = vpack.c.bf16 %v5188_v44, %v5187_v53  ;;  %v3142_v3 = vpop.f32.mrb[99].mxu0 }
 0x560   :  { %v3170_v27 = vpack.c.bf16 %v3142_v3, %v3139_v35 }
 0x561   :  { %v3414_v57 = vrot.slane %v3171_v47, 4 }
 0x562   :  { %v3192_v9 = vrot.slane %v3170_v27, 4  ;;  %5214 = vmatmul.mubr.msk.bf16.vlgmr.msra.gmra.mrb[104].mxu0 %vm3092_vm5, %v3170_v27 }
 0x563   :  { %5230 = vmatpush3.bf16.msra.mxu0 %v5578_v39  ;;  %5237 = vmatprep.mubr.msk.bf16.mxu0 %vm5667_vm6, %v5666_v41 }
 0x564   :  { %5202 = vmatmul.mubr.msk.bf16.vlgmr.msra.gmra.mrb[96].mxu1 %vm3092_vm5, %v3192_v9  ;;  %5231 = vmatprep.subr.bf16.mxu0 %v5666_v41  ;;  %v5191_v2 = vpop.f32.mrb[100].mxu0 }
 0x565   :  { %5218 = vmatpush3.bf16.msra.mxu1 %v5579_v8  ;;  %5225 = vmatprep.mubr.msk.bf16.mxu1 %vm5667_vm6, %v5666_v41  ;;  %v3155_v10 = vpop.f32.mrb[101].mxu0 }
 0x566   :  { %5219 = vmatprep.subr.bf16.mxu1 %v5666_v41  ;;  %v5192_v14 = vpop.f32.mrb[102].mxu0 }
 0x567   :  { %5232 = vmatpush3.bf16.msra.mxu0 %v5580_v59  ;;  %v6906_v22 = vpack.c.bf16 %v5192_v14, %v5191_v2  ;;  %v3158_v58 = vpop.f32.mrb[103].mxu0 }
 0x568   :  { %5233 = vmatprep.subr.bf16.mxu0 %v5666_v41  ;;  %v3172_v11 = vpack.c.bf16 %v3158_v58, %v3155_v10 }
 0x569   :  { %5220 = vmatpush3.bf16.msra.mxu1 %v5581_v4  ;;  %v3726_v34 = vrot.slane %v6906_v22, 4 }
 0x56a   :  { %5221 = vmatprep.subr.bf16.mxu1 %v5666_v41  ;;  %v3570_v62 = vrot.slane %v3172_v11, 4 }
 0x56b   :  { %5234 = vmatpush3.bf16.msra.mxu0 %v5582_v6 }
 0x56c   :  { %5235 = vmatprep.subr.bf16.mxu0 %v5666_v41 }
 0x56d   :  { %5222 = vmatpush3.bf16.msra.mxu1 %v5583_v61 }
 0x56e   :  { %5223 = vmatprep.subr.bf16.mxu1 %v5666_v41 }
 0x56f   :  { %5236 = vmatpush3.bf16.msra.mxu0 %v5584_v45 }
 0x570   :  { %5253 = vmatprep.subr.bf16.mxu0 %v5666_v41 }
 0x571   :  { %5224 = vmatpush3.bf16.msra.mxu1 %v5585_v12 }
 0x572   :  { %5238 = vmatmul.mubr.msk.bf16.vlgmr.msra.gmra.mrb[108].mxu0 %vm3092_vm5, %v3414_v57  ;;  %5241 = vmatprep.subr.bf16.mxu1 %v5666_v41 }
 0x573   :  { %5254 = vmatpush3.bf16.msra.mxu0 %v5586_v51  ;;  %5261 = vmatprep.mubr.msk.bf16.mxu0 %vm5667_vm6, %v5666_v41 }
 0x574   :  { %5226 = vmatmul.mubr.msk.bf16.vlgmr.msra.gmra.mrb[100].mxu1 %vm3092_vm5, %v3171_v47  ;;  %5255 = vmatprep.subr.bf16.mxu0 %v5666_v41 }
 0x575   :  { %5242 = vmatpush3.bf16.msra.mxu1 %v5587_v36  ;;  %5249 = vmatprep.mubr.msk.bf16.mxu1 %vm5667_vm6, %v5666_v41 }
 0x576   :  { %5243 = vmatprep.subr.bf16.mxu1 %v5666_v41 }
 0x577   :  { %5256 = vmatpush3.bf16.msra.mxu0 %v5588_v54 }
 0x578   :  { %5257 = vmatprep.subr.bf16.mxu0 %v5666_v41 }
 0x579   :  { %5244 = vmatpush3.bf16.msra.mxu1 %v5589_v13 }
 0x57a   :  { %5245 = vmatprep.subr.bf16.mxu1 %v5666_v41 }
 0x57b   :  { %5258 = vmatpush3.bf16.msra.mxu0 %v5590_v16 }
 0x57c   :  { %5259 = vmatprep.subr.bf16.mxu0 %v5666_v41 }
 0x57d   :  { %5246 = vmatpush3.bf16.msra.mxu1 %v5591_v17 }
 0x57e   :  { %5247 = vmatprep.subr.bf16.mxu1 %v5666_v41 }
 0x57f   :  { %5260 = vmatpush3.bf16.msra.mxu0 %v5592_v18 }
 0x580   :  { %5277 = vmatprep.subr.bf16.mxu0 %v5666_v41 }
 0x581   :  { %5248 = vmatpush3.bf16.msra.mxu1 %v5593_v20  ;;  %v4593_v20 = vld [vmem:[%s7141_s8] ss:$0 sm:$0xff] }
 0x582   :  { %5262 = vmatmul.mubr.msk.bf16.vlgmr.msra.gmra.mrb[112].mxu0 %vm3092_vm5, %v3570_v62  ;;  %5265 = vmatprep.subr.bf16.mxu1 %v5666_v41 }
 0x583   :  { %5278 = vmatpush3.bf16.msra.mxu0 %v5594_v26  ;;  %5285 = vmatprep.mubr.msk.bf16.mxu0 %vm5667_vm6, %v5666_v41 }
 0x584   :  { %5250 = vmatmul.mubr.msk.bf16.vlgmr.msra.gmra.mrb[104].mxu1 %vm3092_vm5, %v3172_v11  ;;  %5279 = vmatprep.subr.bf16.mxu0 %v5666_v41 }
 0x585   :  { %5266 = vmatpush3.bf16.msra.mxu1 %v5595_v21  ;;  %5273 = vmatprep.mubr.msk.bf16.mxu1 %vm5667_vm6, %v5666_v41 }
 0x586   :  { %5267 = vmatprep.subr.bf16.mxu1 %v5666_v41 }
 0x587   :  { %5280 = vmatpush3.bf16.msra.mxu0 %v5596_v7 }
 0x588   :  { %5281 = vmatprep.subr.bf16.mxu0 %v5666_v41 }
 0x589   :  { %5268 = vmatpush3.bf16.msra.mxu1 %v5597_v24 }
 0x58a   :  { %5269 = vmatprep.subr.bf16.mxu1 %v5666_v41 }
 0x58b   :  { %5282 = vmatpush3.bf16.msra.mxu0 %v5598_v29 }
 0x58c   :  { %5283 = vmatprep.subr.bf16.mxu0 %v5666_v41 }
 0x58d   :  { %5270 = vmatpush3.bf16.msra.mxu1 %v5599_v19  ;;  %v5616_v19 = vld [vmem:[%s7145_s12] ss:$8 sps:$4 sm:$0xff]  }
 0x58e   :  { %5271 = vmatprep.subr.bf16.mxu1 %v5666_v41 }
 0x58f   :  { %5284 = vmatpush3.bf16.msra.mxu0 %v5600_v30 }
 0x590   :  { %5307 = vmatprep.subr.bf16.mxu0 %v5666_v41 }
 0x591   :  { %5272 = vmatpush3.bf16.msra.mxu1 %v5601_v32  ;;  %v5621_v32 = vld [vmem:[%s7145_s12 + $0x14] ss:$8 sps:$4 sm:$0xff]  }
 0x592   :  { %5286 = vmatmul.mubr.msk.bf16.vlgmr.msra.gmra.mrb[116].mxu0 %vm3092_vm5, %v3726_v34  ;;  %5289 = vmatprep.subr.bf16.mxu1 %v5666_v41  ;;  %v5619_v34 = vld [vmem:[%s7145_s12 + $0x10] ss:$8 sps:$4 sm:$0xff]  }
 0x593   :  { %5321 = vmatprep.mubr.msk.bf16.mxu0 %vm5667_vm6, %v5666_v41  ;;  %5308 = vmatpush3.bf16.msra.mxu0 %v5602_v31  ;;  %v5624_v31 = vld [vmem:[%s7145_s12 + $0x24] ss:$8 sps:$4 sm:$0xff]  }
 0x594   :  { %5274 = vmatmul.mubr.msk.bf16.vlgmr.msra.gmra.mrb[108].mxu1 %vm3092_vm5, %v6906_v22  ;;  %5309 = vmatprep.subr.bf16.mxu0 %v5666_v41 }
 0x595   :  { %5303 = vmatprep.mubr.msk.bf16.mxu1 %vm5667_vm6, %v5666_v41  ;;  %5290 = vmatpush3.bf16.msra.mxu1 %v5603_v37  ;;  %v5622_v37 = vld [vmem:[%s7145_s12 + $0x20] ss:$8 sps:$4 sm:$0xff]  }
 0x596   :  { %5291 = vmatprep.subr.bf16.mxu1 %v5666_v41 }
 0x597   :  { %5310 = vmatpush3.bf16.msra.mxu0 %v5604_v40  ;;  %v5627_v40 = vld [vmem:[%s7145_s12 + $0x34] ss:$8 sps:$4 sm:$0xff]  }
 0x598   :  { %5311 = vmatprep.subr.bf16.mxu0 %v5666_v41 }
 0x599   :  { %5292 = vmatpush3.bf16.msra.mxu1 %v5605_v43  ;;  %v5625_v43 = vld [vmem:[%s7145_s12 + $0x30] ss:$8 sps:$4 sm:$0xff]  }
 0x59a   :  { %5293 = vmatprep.subr.bf16.mxu1 %v5666_v41 }
 0x59b   :  { %5312 = vmatpush3.bf16.msra.mxu0 %v5606_v48  ;;  %v5630_v48 = vld [vmem:[%s7145_s12 + $0x44] ss:$8 sps:$4 sm:$0xff]  }
 0x59c   :  { %5313 = vmatprep.subr.bf16.mxu0 %v5666_v41 }
 0x59d   :  { %5294 = vmatpush3.bf16.msra.mxu1 %v5607_v15  ;;  %v5628_v15 = vld [vmem:[%s7145_s12 + $0x40] ss:$8 sps:$4 sm:$0xff]  }
 0x59e   :  { %5295 = vmatprep.subr.bf16.mxu1 %v5666_v41 }
 0x59f   :  { %5314 = vmatpush3.bf16.msra.mxu0 %v5608_v42  ;;  %v5633_v42 = vld [vmem:[%s7145_s12 + $0x54] ss:$8 sps:$4 sm:$0xff]  }
 0x5a0   :  { %5315 = vmatprep.subr.bf16.mxu0 %v5666_v41 }
 0x5a1   :  { %5296 = vmatpush3.bf16.msra.mxu1 %v5609_v38  ;;  %v5631_v38 = vld [vmem:[%s7145_s12 + $0x50] ss:$8 sps:$4 sm:$0xff]  }
 0x5a2   :  { %5297 = vmatprep.subr.bf16.mxu1 %v5666_v41 }
 0x5a3   :  { %5316 = vmatpush3.bf16.msra.mxu0 %v5610_v25  ;;  %v5636_v25 = vld [vmem:[%s7145_s12 + $0x64] ss:$8 sps:$4 sm:$0xff]  }
 0x5a4   :  { %5317 = vmatprep.subr.bf16.mxu0 %v5666_v41 }
 0x5a5   :  { %5298 = vmatpush3.bf16.msra.mxu1 %v5611_v49  ;;  %v5634_v49 = vld [vmem:[%s7145_s12 + $0x60] ss:$8 sps:$4 sm:$0xff]  }
 0x5a6   :  { %5299 = vmatprep.subr.bf16.mxu1 %v5666_v41 }
 0x5a7   :  { %5318 = vmatpush3.bf16.msra.mxu0 %v5612_v28  ;;  %v5639_v28 = vld [vmem:[%s7145_s12 + $0x74] ss:$8 sps:$4 sm:$0xff]  }
 0x5a8   :  { %5319 = vmatprep.subr.bf16.mxu0 %v5666_v41 }
 0x5a9   :  { %5300 = vmatpush3.bf16.msra.mxu1 %v5613_v63  ;;  %v5637_v63 = vld [vmem:[%s7145_s12 + $0x70] ss:$8 sps:$4 sm:$0xff]  }
 0x5aa   :  { %5301 = vmatprep.subr.bf16.mxu1 %v5666_v41 }
 0x5ab   :  { %5320 = vmatpush3.bf16.msra.mxu0 %v3963_v52 }
 0x5ad   :  { %5302 = vmatpush3.bf16.msra.mxu1 %v3878_v55 }
 0x5ae   :  { %4123 = vmatprep.subr.bf16.mxu1 %v5618_v46  ;;  %v4610_v46 = vld [vmem:[%s7144_s11] ss:$0 sm:$0xff]  ;;  %s5670_s11 = smov [#allocation2]  }
 0x5af   :  { %s4184_s18 = sshll.u32 %s5670_s11, 4  ;;  %s4185_s18 = int_to_ptr.vmem [resolvable:$true] %s4184_s18 }
 0x5b0   :  { %p5645_p1 = scmp.lt.s32.totalorder %s4185_s18, %s4185_s18 }
 0x635   :  { %v3321_v56 = vpop.f32.mrb[104].mxu0 }
 0x636   :  { %v5215_v33 = vpop.f32.mrb[105].mxu0 }
 0x637   :  { %v3254_v5 = vpop.f32.mrb[96].mxu1  ;;  %v3324_v23 = vpop.f32.mrb[106].mxu0 }
 0x638   :  { %v3322_v60 = vadd.f32 %v3321_v56, %v3254_v5  ;;  %v5203_v0 = vpop.f32.mrb[97].mxu1  ;;  %v5216_v41 = vpop.f32.mrb[107].mxu0 }
 0x639   :  { %v3257_v53 = vpop.f32.mrb[98].mxu1 }
 0x63a   :  { %v5204_v35 = vpop.f32.mrb[99].mxu1 }
 0x645   :  { %v3476_v44 = vpop.f32.mrb[108].mxu0 }
 0x646   :  { %v5239_v47 = vpop.f32.mrb[109].mxu0 }
 0x647   :  { %v3397_v3 = vpop.f32.mrb[100].mxu1  ;;  %v3479_v39 = vpop.f32.mrb[110].mxu0 }
 0x648   :  { %v3403_v27 = vadd.f32 %v3397_v3, %v3322_v60  ;;  %v5227_v8 = vpop.f32.mrb[101].mxu1  ;;  %v5240_v9 = vpop.f32.mrb[111].mxu0  ;;  %v4031_v39 = vld [vmem:[%s7146_s13] sm:$0x3]  ;;  %s5640_s13 = scalar_lea.vmem %s4185_s18, 64 }
 0x649   :  { %v3400_v59 = vpop.f32.mrb[102].mxu1  ;;  %v5669_v8 = vmov 1983009808   ;;  %p5641_p0 = scmp.ne.s32.totalorder %s4185_s18, %s5640_s13  ;;  %p5646_p2 = scmp.lt.s32.totalorder %s5640_s13, %s5640_s13 }
 0x64a   :  { %v5228_v2 = vpop.f32.mrb[103].mxu1  ;;  %v3482_v4 = vadd.f32 %v3476_v44, %v3403_v27  ;;  %v4033_v44 = vlaneseq  ;;  %v4168_v9 = vunpack.c.l.s4 %v5669_v8 }
 0x64b   :  { %p5647_p3 = por %p5646_p2, %p5645_p1 }
 0x64c   :  { %v4034_v47 = vshrl.u32 %v4033_v44, 7 }
 0x64d   :  { %p5648_p4 = pnand %p5647_p3, %p5641_p0 }
 0x64e   :  { %v4035_v3 = vsub.s32 0, %v4034_v47  ;;  %v4039_v27 = vsub.s32 1, %v4034_v47 }
 0x650   :  { %v4036_v59 = vrot.slane %v4031_v39, %v4035_v3  ;;  %v4040_v2 = vrot.slane %v4031_v39, %v4039_v27 }
 0x655   :  { %v3632_v10 = vpop.f32.mrb[112].mxu0 }
 0x656   :  { %v5263_v14 = vpop.f32.mrb[113].mxu0 }
 0x657   :  { %v3553_v6 = vpop.f32.mrb[104].mxu1  ;;  %v3635_v22 = vpop.f32.mrb[114].mxu0 }
 0x658   :  { %v3559_v58 = vadd.f32 %v3553_v6, %v3482_v4  ;;  %v5251_v11 = vpop.f32.mrb[105].mxu1  ;;  %v5264_v61 = vpop.f32.mrb[115].mxu0  ;;  %v4169_v4 = vunpack.c.0.s8 %v4168_v9 }
 0x659   :  { %v3556_v45 = vpop.f32.mrb[106].mxu1 }
 0x65a   :  { %v3638_v12 = vadd.f32 %v3632_v10, %v3559_v58  ;;  %v5252_v51 = vpop.f32.mrb[107].mxu1  ;;  %v4172_v11 = vsub.s32 %v4169_v4, %v4034_v47 }
 0x665   :  { %v3788_v57 = vpop.f32.mrb[116].mxu0 }
 0x666   :  { %v5287_v36 = vpop.f32.mrb[117].mxu0 }
 0x667   :  { %v3709_v54 = vpop.f32.mrb[108].mxu1  ;;  %v3791_v13 = vpop.f32.mrb[118].mxu0 }
 0x668   :  { %v3715_v16 = vadd.f32 %v3709_v54, %v3638_v12  ;;  %v5275_v17 = vpop.f32.mrb[109].mxu1  ;;  %v5288_v18 = vpop.f32.mrb[119].mxu0 }
 0x669   :  { %v3712_v62 = vpop.f32.mrb[110].mxu1 }
 0x66a   :  { %v3794_v26 = vadd.f32 %v3788_v57, %v3715_v16  ;;  %v5276_v21 = vpop.f32.mrb[111].mxu1 }
 0x66c   :  { %v3802_v7 = vadd.f32 %v4593_v20, %v3794_v26 }
 0x66e   :  { %v3803_v24 = vmax.f32 %v3802_v7, 0.0 }
 0x670   :  { %v3804_v29 = vpack.c.bf16 %v3803_v24, %v3803_v24 }
 0x672   :  { %v3832_v30 = vrot.slane %v3804_v29, 1  ;;  %5322 = vmatmul.mubr.msk.bf16.vlgmr.msra.gmra.mrb[120].mxu0 %vm3872_vm8, %v3804_v29 }
 0x674   :  { %5304 = vmatmul.mubr.msk.bf16.vlgmr.msra.gmra.mrb[112].mxu1 %vm3872_vm8, %v3832_v30 }
 0x675   :  { %4124 = vmatpush1.bf16.msra.mxu1 %v5616_v19  ;;  %4155 = vmatprep.mubr.bf16.mxu1 %v5668_v50 }
 0x676   :  { %4125 = vmatprep.subr.bf16.mxu1 %v5621_v32 }
 0x679   :  { %4126 = vmatpush1.bf16.msra.mxu1 %v5619_v34 }
 0x67a   :  { %4127 = vmatprep.subr.bf16.mxu1 %v5624_v31 }
 0x67d   :  { %4128 = vmatpush1.bf16.msra.mxu1 %v5622_v37 }
 0x67e   :  { %4129 = vmatprep.subr.bf16.mxu1 %v5627_v40 }
 0x681   :  { %4130 = vmatpush1.bf16.msra.mxu1 %v5625_v43 }
 0x682   :  { %4131 = vmatprep.subr.bf16.mxu1 %v5630_v48 }
 0x685   :  { %4132 = vmatpush1.bf16.msra.mxu1 %v5628_v15 }
 0x686   :  { %4133 = vmatprep.subr.bf16.mxu1 %v5633_v42 }
 0x689   :  { %4134 = vmatpush1.bf16.msra.mxu1 %v5631_v38 }
 0x68a   :  { %4135 = vmatprep.subr.bf16.mxu1 %v5636_v25 }
 0x68d   :  { %4136 = vmatpush1.bf16.msra.mxu1 %v5634_v49 }
 0x68e   :  { %4137 = vmatprep.subr.bf16.mxu1 %v5639_v28 }
 0x691   :  { %4138 = vmatpush1.bf16.msra.mxu1 %v5637_v63 }
 0x745   :  { %v3999_v52 = vpop.f32.mrb[120].mxu0 }
 0x746   :  { %v5323_v1 = vpop.f32.mrb[121].mxu0 }
 0x747   :  { %v3914_v55 = vpop.f32.mrb[112].mxu1  ;;  %v4002_v56 = vpop.f32.mrb[122].mxu0 }
 0x748   :  { %v4000_v33 = vadd.f32 %v3999_v52, %v3914_v55  ;;  %v5305_v5 = vpop.f32.mrb[113].mxu1  ;;  %v5324_v23 = vpop.f32.mrb[123].mxu0 }
 0x749   :  { %v3917_v60 = vpop.f32.mrb[114].mxu1 }
 0x74a   :  { %v4012_v0 = vadd.f32 %v4610_v46, %v4000_v33  ;;  %v5306_v41 = vpop.f32.mrb[115].mxu1 }
 0x74c   :  { %v4013_v53 = vmax.f32 %v4012_v0, 0.0 }
 0x74e   :  { %v4014_v35 = vpack.c.bf16 %v4013_v53, %v4013_v53 }
 0x750   :  { %4156 = vmatmul.mubr.bf16.vlgmr.msra.gmra.mrb[116].mxu1 %v4014_v35 }
 0x823   :  { %v4157_v10 = vpop.f32.mrb[116].mxu1 }
 0x824   :  { %v4158_v14 = vadd.f32 %v4157_v10, %v4036_v59  ;;  %v4159_v6 = vpop.f32.mrb[117].mxu1 }
 0x825   :  { %v4160_v22 = vadd.f32 %v4159_v6, %v4040_v2  ;;  %v4161_v58 = vpop.f32.mrb[118].mxu1 }
 0x826   :  { %v4162_v61 = vpop.f32.mrb[119].mxu1 }
 0x827   :  { %v4166_v45 = vcombine.low %v4158_v14, %v4160_v22 }
 0x829   :  { %v4173_v12 = vrot.slane %v4166_v45, %v4172_v11 }
 0x82b   :  { %4177 = vst.msk [vmem:[#allocation2] sm:$0xf] %vm4176_vm10, %v4173_v12 }
 0x82c   :  { %5651 = shalt.err (!%p5648_p4)
}
 0x82d   :  { %s5652_s21 = scalar_lea.hbm %s7147_s14, 64 }
 0x82e   :  { %p5653_p5 = scmp.ne.s32.totalorder %s7147_s14, %s5652_s21  ;;  %p5656_p6 = scmp.lt.u32.totalorder %s5652_s21, %s7147_s14 }
 0x830   :  { %p5658_p7 = pnand %p5656_p6, %p5653_p5 }
 0x832   :  { %5661 = shalt.err (!%p5658_p7)
}
 0x833   :  { %4187 = dma.vmem_to_hbm [thread:$0]  %s4185_s18, 64, %s7147_s14, [#allocation3]  }
 0x834   :  { %5662 = dma.done.wait [#allocation3], 64  }
 0x835   :  { %5663 = vsyncadd [#allocation3], 4294967232 }
 0x836   :  { %4191 = vsyncpa [#allocation3], 1 }

</bundles_post_ra>
